<compile_context>
chip_gen: v6e
topology: v6e:2x2x1
jax: 0.10.0
libtpu: 0.0.40
codegen_flags: <defaults>
</compile_context>

<pallas_src>
import jax
import jax.numpy as jnp
from jax.experimental import pallas as pl
from jax.experimental.pallas import tpu as pltpu


def _round_up(x, m):
    return ((x + m - 1) // m) * m


def _conv_mm_kernel(p_ref, w_ref, b_ref, o_ref):
    """Fused (im2col-patches @ weight) + bias + ReLU on the MXU/VPU.

    bf16 operands feed the MXU; accumulation, bias add and ReLU stay in f32;
    the store is bf16.  There is no K grid axis, so the epilogue runs exactly
    once per row tile (if a K axis is ever added, gate the epilogue with
    pl.when on the last k).
    """
    acc = jnp.dot(p_ref[...], w_ref[...], preferred_element_type=jnp.float32)
    acc = acc + b_ref[...]
    o_ref[...] = jnp.maximum(acc, 0.0).astype(o_ref.dtype)


def _choose_row_tile(M):
    """Row tile: big tiles for big M (better HBM-roofline fraction), and at
    least 2 tiles whenever M >= 16 so both v7x TensorCores get work."""
    if M >= 4096:
        return 1024
    if M >= 1024:
        return 512
    return max(8, _round_up((M + 1) // 2, 8))


def _fused_matmul_bias_relu(patches, weight, bias):
    """patches (M, K) bf16 @ weight (K, N) bf16 + bias (1, N) f32 -> (M, N) bf16."""
    M, K = patches.shape
    _, N = weight.shape

    TM = _choose_row_tile(M)
    Mpad = _round_up(M, TM)
    if Mpad != M:
        patches = jnp.pad(patches, ((0, Mpad - M), (0, 0)))
    grid = Mpad // TM

    # Actual VMEM footprint: double-buffered patch/output tiles + resident
    # weight/bias.  Request a generous multiple, clamped well below every
    # generation's physical VMEM (v7x has only 64 MiB per TC).
    tile_bytes = 2 * (TM * K * 2) + 2 * (TM * N * 2) + K * N * 2 + N * 4
    vmem_limit = int(min(32 * 1024 * 1024, max(4 * 1024 * 1024, 4 * tile_bytes)))

    bytes_accessed = Mpad * K * 2 + K * N * 2 + N * 4 + Mpad * N * 2

    out = pl.pallas_call(
        _conv_mm_kernel,
        out_shape=jax.ShapeDtypeStruct((Mpad, N), jnp.bfloat16),
        grid=(grid,),
        in_specs=[
            pl.BlockSpec((TM, K), lambda i: (i, 0)),   # row tile of patches
            pl.BlockSpec((K, N), lambda i: (0, 0)),    # full weight, resident
            pl.BlockSpec((1, N), lambda i: (0, 0)),    # full bias, resident
        ],
        out_specs=pl.BlockSpec((TM, N), lambda i: (i, 0)),
        compiler_params=pltpu.CompilerParams(
            dimension_semantics=("parallel",),   # shard row tiles across TCs
            vmem_limit_bytes=vmem_limit,
        ),
        cost_estimate=pl.CostEstimate(
            flops=2 * Mpad * K * N,
            transcendentals=0,
            bytes_accessed=bytes_accessed,
        ),
    )(patches, weight, bias)
    if Mpad != M:
        out = out[:M]   # drop ReLU(bias) garbage rows introduced by M padding
    return out


def _im2col_nhwc(x, kh, kw, stride, pad):
    """Patch extraction (static slicing / stack only, runs in XLA, bf16 input).

    TODO(synk): the 9x patch tensor is still materialized by XLA in HBM; a
    fully fused in-kernel halo-DMA im2col (tap grid axis + f32 VMEM
    accumulator) would cut input-side HBM traffic ~3x further and is the
    remaining optimization.
    """
    B, H, W, C = x.shape
    xp = jnp.pad(x, ((0, 0), (pad, pad), (pad, pad), (0, 0)))
    Ho = (H + 2 * pad - kh) // stride + 1
    Wo = (W + 2 * pad - kw) // stride + 1
    cols = []
    for i in range(kh):
        for j in range(kw):
            cols.append(xp[:, i:i + stride * Ho:stride, j:j + stride * Wo:stride, :])
    patches = jnp.stack(cols, axis=3)                       # (B, Ho, Wo, kh*kw, C)
    patches = patches.reshape(B * Ho * Wo, kh * kw * C)     # (M, K) bf16
    return patches, Ho, Wo


def conv2d_bias_relu(x_nhwc, w_oihw, bias, stride, pad):
    """3x3 conv (PyTorch OIHW weights) + bias + ReLU; the matmul runs in Pallas."""
    Cout, Cin, kh, kw = w_oihw.shape
    x_nhwc = x_nhwc.astype(jnp.bfloat16)     # cast BEFORE im2col (9x tensor in bf16)
    patches, Ho, Wo = _im2col_nhwc(x_nhwc, kh, kw, stride, pad)

    # OIHW -> (kh, kw, Cin, Cout) to match im2col's (tap, channel) flattening.
    w_mat = jnp.transpose(w_oihw, (2, 3, 1, 0)).reshape(kh * kw * Cin, Cout)

    K = kh * kw * Cin
    K16 = _round_up(K, 16)                   # bf16 sublane packing is (16, 128)
    if K16 != K:
        patches = jnp.pad(patches, ((0, 0), (0, K16 - K)))
        w_mat = jnp.pad(w_mat, ((0, K16 - K), (0, 0)))
    # No Cout lane padding: narrow (masked) bf16 stores beat 128-lane padded
    # stores here because the kernel is HBM-write-bound on the small-Cout
    # layers (block last dim == full array dim, so this remains a legal block).

    out = _fused_matmul_bias_relu(
        patches,                                       # bf16
        w_mat.astype(jnp.bfloat16),                    # bf16 MXU operand
        bias.reshape(1, Cout).astype(jnp.float32),     # f32 epilogue
    )
    B = x_nhwc.shape[0]
    return out.reshape(B, Ho, Wo, Cout)                # bf16 feature map


class BackboneBase:
    """JAX/Pallas port of detr BackboneBase with a synthetic ResNet-like body."""

    def __init__(self, key, train_backbone=False, num_channels=64,
                 return_interm_layers=False):
        self.num_channels = num_channels
        self.return_interm_layers = return_interm_layers
        # synthetic backbone: stem, layer1, layer2, layer3, layer4 (stride 2 each)
        chans = [3, 8, 8, 16, 32, num_channels]
        self.params = []
        for li in range(5):
            key, wk, bk = jax.random.split(key, 3)
            cin, cout = chans[li], chans[li + 1]
            w = jax.random.normal(wk, (cout, cin, 3, 3), jnp.float32) * 0.1
            b = jax.random.normal(bk, (cout,), jnp.float32) * 0.01
            self.params.append((w, b))
        self._jit_forward = jax.jit(self._forward)

    def _forward(self, tensor_nchw):
        # TODO(synk): the check_featuremap debug branch (denormalize, matplotlib
        # plotting, PNG file writes, prints) has no Pallas/JAX equivalent and
        # does not affect the returned value; intentionally skipped.
        x = jnp.transpose(tensor_nchw, (0, 2, 3, 1))  # NCHW -> NHWC kernel path
        feats = []
        for (w, b) in self.params:
            x = conv2d_bias_relu(x, w, b, stride=2, pad=1)   # bf16 between layers
            feats.append(x)
        # IntermediateLayerGetter semantics
        if self.return_interm_layers:
            selected, names = feats[1:5], ['0', '1', '2', '3']
        else:
            selected, names = [feats[4]], ['0']
        # return NCHW f32 dict to match the PyTorch module's output convention
        return {n: jnp.transpose(f, (0, 3, 1, 2)).astype(jnp.float32)
                for n, f in zip(names, selected)}

    def forward(self, tensor_nchw):
        return self._jit_forward(tensor_nchw)


if __name__ == "__main__":
    key = jax.random.PRNGKey(0)
    pkey, xkey = jax.random.split(key)
    model = BackboneBase(pkey, train_backbone=False, num_channels=64,
                         return_interm_layers=False)
    # small "image" batch: (B, 3, H, W) NCHW, like normalized RGB input
    x = jax.random.normal(xkey, (2, 3, 64, 64), jnp.float32)
    xs = model.forward(x)
    for v in xs.values():
        jax.block_until_ready(v)
    assert xs['0'].shape == (2, model.num_channels, 2, 2), xs['0'].shape
    print("KERNEL_OK")
</pallas_src>

<mosaic_0001>
module attributes {stable_mosaic.version = 11 : i64} {
  func.func @_conv_mm_kernel(%arg0: i32, %arg1: memref<512x32xbf16, #tpu.memory_space<vmem>>, %arg2: memref<32x8xbf16, #tpu.memory_space<vmem>>, %arg3: memref<1x8xf32, #tpu.memory_space<vmem>>, %arg4: memref<512x8xbf16, #tpu.memory_space<vmem>>) attributes {dimension_semantics = [#tpu.dimension_semantics<parallel>], iteration_bounds = array<i64: 4>, scalar_prefetch = 0 : i64, scratch_operands = 0 : i64, tpu.core_type = #tpu.core_type<tc>, window_params = [{transform_indices = @transform_0, window_bounds = array<i64: 512, 32>}, {pipeline_mode = #tpu.pipeline_mode<synchronous>, transform_indices = @transform_1, window_bounds = array<i64: 32, 8>}, {pipeline_mode = #tpu.pipeline_mode<synchronous>, transform_indices = @transform_2, window_bounds = array<i64: 1, 8>}, {transform_indices = @transform_3, window_bounds = array<i64: 512, 8>}]} {
    %c0 = arith.constant 0 : index
    %c0_0 = arith.constant 0 : index
    %0 = vector.load %arg1[%c0, %c0_0] : memref<512x32xbf16, #tpu.memory_space<vmem>>, vector<512x32xbf16>
    %c0_1 = arith.constant 0 : index
    %c0_2 = arith.constant 0 : index
    %1 = vector.load %arg2[%c0_1, %c0_2] : memref<32x8xbf16, #tpu.memory_space<vmem>>, vector<32x8xbf16>
    %cst = arith.constant dense<0.000000e+00> : vector<512x8xf32>
    %2 = tpu.matmul %0, %1, %cst {dimension_numbers = #tpu.dot_dimension_numbers<[1], [0], [0], [1], [0, 0, 1, 1], [], []>} : vector<512x32xbf16>, vector<32x8xbf16>, vector<512x8xf32> -> vector<512x8xf32>
    %c0_3 = arith.constant 0 : index
    %c0_4 = arith.constant 0 : index
    %3 = vector.load %arg3[%c0_3, %c0_4] : memref<1x8xf32, #tpu.memory_space<vmem>>, vector<1x8xf32>
    %4 = vector.broadcast %3 : vector<1x8xf32> to vector<512x8xf32>
    %5 = arith.addf %2, %4 : vector<512x8xf32>
    %cst_5 = arith.constant 0.000000e+00 : f32
    %6 = vector.broadcast %cst_5 : f32 to vector<512x8xf32>
    %7 = arith.maximumf %5, %6 : vector<512x8xf32>
    %8 = arith.truncf %7 : vector<512x8xf32> to vector<512x8xbf16>
    %c0_6 = arith.constant 0 : index
    %c0_7 = arith.constant 0 : index
    %9 = vector.load %arg4[%c0_6, %c0_7] : memref<512x8xbf16, #tpu.memory_space<vmem>>, vector<512x8xbf16>
    tpu.vector_store %arg4[%c0_6, %c0_7], %8 {strides = array<i32>} : memref<512x8xbf16, #tpu.memory_space<vmem>>, vector<512x8xbf16>,
    return
  }
  func.func @transform_0(%arg0: i32) -> (i32, i32) {
    %c0_i32 = arith.constant 0 : i32
    %c0_i32_0 = arith.constant 0 : i32
    return %arg0, %c0_i32 : i32, i32
  }
  func.func @transform_1(%arg0: i32) -> (i32, i32) {
    %c0_i32 = arith.constant 0 : i32
    %c0_i32_0 = arith.constant 0 : i32
    %c0_i32_1 = arith.constant 0 : i32
    return %c0_i32, %c0_i32_0 : i32, i32
  }
  func.func @transform_2(%arg0: i32) -> (i32, i32) {
    %c0_i32 = arith.constant 0 : i32
    %c0_i32_0 = arith.constant 0 : i32
    %c0_i32_1 = arith.constant 0 : i32
    return %c0_i32, %c0_i32_0 : i32, i32
  }
  func.func @transform_3(%arg0: i32) -> (i32, i32) {
    %c0_i32 = arith.constant 0 : i32
    %c0_i32_0 = arith.constant 0 : i32
    return %arg0, %c0_i32 : i32, i32
  }
}

module attributes {stable_mosaic.version = 11 : i64} {
  func.func @_conv_mm_kernel(%arg0: i32, %arg1: memref<256x80xbf16, #tpu.memory_space<vmem>>, %arg2: memref<80x8xbf16, #tpu.memory_space<vmem>>, %arg3: memref<1x8xf32, #tpu.memory_space<vmem>>, %arg4: memref<256x8xbf16, #tpu.memory_space<vmem>>) attributes {dimension_semantics = [#tpu.dimension_semantics<parallel>], iteration_bounds = array<i64: 2>, scalar_prefetch = 0 : i64, scratch_operands = 0 : i64, tpu.core_type = #tpu.core_type<tc>, window_params = [{transform_indices = @transform_0, window_bounds = array<i64: 256, 80>}, {pipeline_mode = #tpu.pipeline_mode<synchronous>, transform_indices = @transform_1, window_bounds = array<i64: 80, 8>}, {pipeline_mode = #tpu.pipeline_mode<synchronous>, transform_indices = @transform_2, window_bounds = array<i64: 1, 8>}, {transform_indices = @transform_3, window_bounds = array<i64: 256, 8>}]} {
    %c0 = arith.constant 0 : index
    %c0_0 = arith.constant 0 : index
    %0 = vector.load %arg1[%c0, %c0_0] : memref<256x80xbf16, #tpu.memory_space<vmem>>, vector<256x80xbf16>
    %c0_1 = arith.constant 0 : index
    %c0_2 = arith.constant 0 : index
    %1 = vector.load %arg2[%c0_1, %c0_2] : memref<80x8xbf16, #tpu.memory_space<vmem>>, vector<80x8xbf16>
    %cst = arith.constant dense<0.000000e+00> : vector<256x8xf32>
    %2 = tpu.matmul %0, %1, %cst {dimension_numbers = #tpu.dot_dimension_numbers<[1], [0], [0], [1], [0, 0, 1, 1], [], []>} : vector<256x80xbf16>, vector<80x8xbf16>, vector<256x8xf32> -> vector<256x8xf32>
    %c0_3 = arith.constant 0 : index
    %c0_4 = arith.constant 0 : index
    %3 = vector.load %arg3[%c0_3, %c0_4] : memref<1x8xf32, #tpu.memory_space<vmem>>, vector<1x8xf32>
    %4 = vector.broadcast %3 : vector<1x8xf32> to vector<256x8xf32>
    %5 = arith.addf %2, %4 : vector<256x8xf32>
    %cst_5 = arith.constant 0.000000e+00 : f32
    %6 = vector.broadcast %cst_5 : f32 to vector<256x8xf32>
    %7 = arith.maximumf %5, %6 : vector<256x8xf32>
    %8 = arith.truncf %7 : vector<256x8xf32> to vector<256x8xbf16>
    %c0_6 = arith.constant 0 : index
    %c0_7 = arith.constant 0 : index
    %9 = vector.load %arg4[%c0_6, %c0_7] : memref<256x8xbf16, #tpu.memory_space<vmem>>, vector<256x8xbf16>
    tpu.vector_store %arg4[%c0_6, %c0_7], %8 {strides = array<i32>} : memref<256x8xbf16, #tpu.memory_space<vmem>>, vector<256x8xbf16>,
    return
  }
  func.func @transform_0(%arg0: i32) -> (i32, i32) {
    %c0_i32 = arith.constant 0 : i32
    %c0_i32_0 = arith.constant 0 : i32
    return %arg0, %c0_i32 : i32, i32
  }
  func.func @transform_1(%arg0: i32) -> (i32, i32) {
    %c0_i32 = arith.constant 0 : i32
    %c0_i32_0 = arith.constant 0 : i32
    %c0_i32_1 = arith.constant 0 : i32
    return %c0_i32, %c0_i32_0 : i32, i32
  }
  func.func @transform_2(%arg0: i32) -> (i32, i32) {
    %c0_i32 = arith.constant 0 : i32
    %c0_i32_0 = arith.constant 0 : i32
    %c0_i32_1 = arith.constant 0 : i32
    return %c0_i32, %c0_i32_0 : i32, i32
  }
  func.func @transform_3(%arg0: i32) -> (i32, i32) {
    %c0_i32 = arith.constant 0 : i32
    %c0_i32_0 = arith.constant 0 : i32
    return %arg0, %c0_i32 : i32, i32
  }
}

module attributes {stable_mosaic.version = 11 : i64} {
  func.func @_conv_mm_kernel(%arg0: i32, %arg1: memref<64x80xbf16, #tpu.memory_space<vmem>>, %arg2: memref<80x16xbf16, #tpu.memory_space<vmem>>, %arg3: memref<1x16xf32, #tpu.memory_space<vmem>>, %arg4: memref<64x16xbf16, #tpu.memory_space<vmem>>) attributes {dimension_semantics = [#tpu.dimension_semantics<parallel>], iteration_bounds = array<i64: 2>, scalar_prefetch = 0 : i64, scratch_operands = 0 : i64, tpu.core_type = #tpu.core_type<tc>, window_params = [{transform_indices = @transform_0, window_bounds = array<i64: 64, 80>}, {pipeline_mode = #tpu.pipeline_mode<synchronous>, transform_indices = @transform_1, window_bounds = array<i64: 80, 16>}, {pipeline_mode = #tpu.pipeline_mode<synchronous>, transform_indices = @transform_2, window_bounds = array<i64: 1, 16>}, {transform_indices = @transform_3, window_bounds = array<i64: 64, 16>}]} {
    %c0 = arith.constant 0 : index
    %c0_0 = arith.constant 0 : index
    %0 = vector.load %arg1[%c0, %c0_0] : memref<64x80xbf16, #tpu.memory_space<vmem>>, vector<64x80xbf16>
    %c0_1 = arith.constant 0 : index
    %c0_2 = arith.constant 0 : index
    %1 = vector.load %arg2[%c0_1, %c0_2] : memref<80x16xbf16, #tpu.memory_space<vmem>>, vector<80x16xbf16>
    %cst = arith.constant dense<0.000000e+00> : vector<64x16xf32>
    %2 = tpu.matmul %0, %1, %cst {dimension_numbers = #tpu.dot_dimension_numbers<[1], [0], [0], [1], [0, 0, 1, 1], [], []>} : vector<64x80xbf16>, vector<80x16xbf16>, vector<64x16xf32> -> vector<64x16xf32>
    %c0_3 = arith.constant 0 : index
    %c0_4 = arith.constant 0 : index
    %3 = vector.load %arg3[%c0_3, %c0_4] : memref<1x16xf32, #tpu.memory_space<vmem>>, vector<1x16xf32>
    %4 = vector.broadcast %3 : vector<1x16xf32> to vector<64x16xf32>
    %5 = arith.addf %2, %4 : vector<64x16xf32>
    %cst_5 = arith.constant 0.000000e+00 : f32
    %6 = vector.broadcast %cst_5 : f32 to vector<64x16xf32>
    %7 = arith.maximumf %5, %6 : vector<64x16xf32>
    %8 = arith.truncf %7 : vector<64x16xf32> to vector<64x16xbf16>
    %c0_6 = arith.constant 0 : index
    %c0_7 = arith.constant 0 : index
    %9 = vector.load %arg4[%c0_6, %c0_7] : memref<64x16xbf16, #tpu.memory_space<vmem>>, vector<64x16xbf16>
    tpu.vector_store %arg4[%c0_6, %c0_7], %8 {strides = array<i32>} : memref<64x16xbf16, #tpu.memory_space<vmem>>, vector<64x16xbf16>,
    return
  }
  func.func @transform_0(%arg0: i32) -> (i32, i32) {
    %c0_i32 = arith.constant 0 : i32
    %c0_i32_0 = arith.constant 0 : i32
    return %arg0, %c0_i32 : i32, i32
  }
  func.func @transform_1(%arg0: i32) -> (i32, i32) {
    %c0_i32 = arith.constant 0 : i32
    %c0_i32_0 = arith.constant 0 : i32
    %c0_i32_1 = arith.constant 0 : i32
    return %c0_i32, %c0_i32_0 : i32, i32
  }
  func.func @transform_2(%arg0: i32) -> (i32, i32) {
    %c0_i32 = arith.constant 0 : i32
    %c0_i32_0 = arith.constant 0 : i32
    %c0_i32_1 = arith.constant 0 : i32
    return %c0_i32, %c0_i32_0 : i32, i32
  }
  func.func @transform_3(%arg0: i32) -> (i32, i32) {
    %c0_i32 = arith.constant 0 : i32
    %c0_i32_0 = arith.constant 0 : i32
    return %arg0, %c0_i32 : i32, i32
  }
}

module attributes {stable_mosaic.version = 11 : i64} {
  func.func @_conv_mm_kernel(%arg0: i32, %arg1: memref<16x144xbf16, #tpu.memory_space<vmem>>, %arg2: memref<144x32xbf16, #tpu.memory_space<vmem>>, %arg3: memref<1x32xf32, #tpu.memory_space<vmem>>, %arg4: memref<16x32xbf16, #tpu.memory_space<vmem>>) attributes {dimension_semantics = [#tpu.dimension_semantics<parallel>], iteration_bounds = array<i64: 2>, scalar_prefetch = 0 : i64, scratch_operands = 0 : i64, tpu.core_type = #tpu.core_type<tc>, window_params = [{transform_indices = @transform_0, window_bounds = array<i64: 16, 144>}, {pipeline_mode = #tpu.pipeline_mode<synchronous>, transform_indices = @transform_1, window_bounds = array<i64: 144, 32>}, {pipeline_mode = #tpu.pipeline_mode<synchronous>, transform_indices = @transform_2, window_bounds = array<i64: 1, 32>}, {transform_indices = @transform_3, window_bounds = array<i64: 16, 32>}]} {
    %c0 = arith.constant 0 : index
    %c0_0 = arith.constant 0 : index
    %0 = vector.load %arg1[%c0, %c0_0] : memref<16x144xbf16, #tpu.memory_space<vmem>>, vector<16x144xbf16>
    %c0_1 = arith.constant 0 : index
    %c0_2 = arith.constant 0 : index
    %1 = vector.load %arg2[%c0_1, %c0_2] : memref<144x32xbf16, #tpu.memory_space<vmem>>, vector<144x32xbf16>
    %cst = arith.constant dense<0.000000e+00> : vector<16x32xf32>
    %2 = tpu.matmul %0, %1, %cst {dimension_numbers = #tpu.dot_dimension_numbers<[1], [0], [0], [1], [0, 0, 1, 1], [], []>} : vector<16x144xbf16>, vector<144x32xbf16>, vector<16x32xf32> -> vector<16x32xf32>
    %c0_3 = arith.constant 0 : index
    %c0_4 = arith.constant 0 : index
    %3 = vector.load %arg3[%c0_3, %c0_4] : memref<1x32xf32, #tpu.memory_space<vmem>>, vector<1x32xf32>
    %4 = vector.broadcast %3 : vector<1x32xf32> to vector<16x32xf32>
    %5 = arith.addf %2, %4 : vector<16x32xf32>
    %cst_5 = arith.constant 0.000000e+00 : f32
    %6 = vector.broadcast %cst_5 : f32 to vector<16x32xf32>
    %7 = arith.maximumf %5, %6 : vector<16x32xf32>
    %8 = arith.truncf %7 : vector<16x32xf32> to vector<16x32xbf16>
    %c0_6 = arith.constant 0 : index
    %c0_7 = arith.constant 0 : index
    %9 = vector.load %arg4[%c0_6, %c0_7] : memref<16x32xbf16, #tpu.memory_space<vmem>>, vector<16x32xbf16>
    tpu.vector_store %arg4[%c0_6, %c0_7], %8 {strides = array<i32>} : memref<16x32xbf16, #tpu.memory_space<vmem>>, vector<16x32xbf16>,
    return
  }
  func.func @transform_0(%arg0: i32) -> (i32, i32) {
    %c0_i32 = arith.constant 0 : i32
    %c0_i32_0 = arith.constant 0 : i32
    return %arg0, %c0_i32 : i32, i32
  }
  func.func @transform_1(%arg0: i32) -> (i32, i32) {
    %c0_i32 = arith.constant 0 : i32
    %c0_i32_0 = arith.constant 0 : i32
    %c0_i32_1 = arith.constant 0 : i32
    return %c0_i32, %c0_i32_0 : i32, i32
  }
  func.func @transform_2(%arg0: i32) -> (i32, i32) {
    %c0_i32 = arith.constant 0 : i32
    %c0_i32_0 = arith.constant 0 : i32
    %c0_i32_1 = arith.constant 0 : i32
    return %c0_i32, %c0_i32_0 : i32, i32
  }
  func.func @transform_3(%arg0: i32) -> (i32, i32) {
    %c0_i32 = arith.constant 0 : i32
    %c0_i32_0 = arith.constant 0 : i32
    return %arg0, %c0_i32 : i32, i32
  }
}

module attributes {stable_mosaic.version = 11 : i64} {
  func.func @_conv_mm_kernel(%arg0: i32, %arg1: memref<8x288xbf16, #tpu.memory_space<vmem>>, %arg2: memref<288x64xbf16, #tpu.memory_space<vmem>>, %arg3: memref<1x64xf32, #tpu.memory_space<vmem>>, %arg4: memref<8x64xbf16, #tpu.memory_space<vmem>>) attributes {dimension_semantics = [#tpu.dimension_semantics<parallel>], iteration_bounds = array<i64: 1>, scalar_prefetch = 0 : i64, scratch_operands = 0 : i64, tpu.core_type = #tpu.core_type<tc>, window_params = [{transform_indices = @transform_0, window_bounds = array<i64: 8, 288>}, {pipeline_mode = #tpu.pipeline_mode<synchronous>, transform_indices = @transform_1, window_bounds = array<i64: 288, 64>}, {pipeline_mode = #tpu.pipeline_mode<synchronous>, transform_indices = @transform_2, window_bounds = array<i64: 1, 64>}, {transform_indices = @transform_3, window_bounds = array<i64: 8, 64>}]} {
    %c0 = arith.constant 0 : index
    %c0_0 = arith.constant 0 : index
    %0 = vector.load %arg1[%c0, %c0_0] : memref<8x288xbf16, #tpu.memory_space<vmem>>, vector<8x288xbf16>
    %c0_1 = arith.constant 0 : index
    %c0_2 = arith.constant 0 : index
    %1 = vector.load %arg2[%c0_1, %c0_2] : memref<288x64xbf16, #tpu.memory_space<vmem>>, vector<288x64xbf16>
    %cst = arith.constant dense<0.000000e+00> : vector<8x64xf32>
    %2 = tpu.matmul %0, %1, %cst {dimension_numbers = #tpu.dot_dimension_numbers<[1], [0], [0], [1], [0, 0, 1, 1], [], []>} : vector<8x288xbf16>, vector<288x64xbf16>, vector<8x64xf32> -> vector<8x64xf32>
    %c0_3 = arith.constant 0 : index
    %c0_4 = arith.constant 0 : index
    %3 = vector.load %arg3[%c0_3, %c0_4] : memref<1x64xf32, #tpu.memory_space<vmem>>, vector<1x64xf32>
    %4 = vector.broadcast %3 : vector<1x64xf32> to vector<8x64xf32>
    %5 = arith.addf %2, %4 : vector<8x64xf32>
    %cst_5 = arith.constant 0.000000e+00 : f32
    %6 = vector.broadcast %cst_5 : f32 to vector<8x64xf32>
    %7 = arith.maximumf %5, %6 : vector<8x64xf32>
    %8 = arith.truncf %7 : vector<8x64xf32> to vector<8x64xbf16>
    %c0_6 = arith.constant 0 : index
    %c0_7 = arith.constant 0 : index
    %9 = vector.load %arg4[%c0_6, %c0_7] : memref<8x64xbf16, #tpu.memory_space<vmem>>, vector<8x64xbf16>
    tpu.vector_store %arg4[%c0_6, %c0_7], %8 {strides = array<i32>} : memref<8x64xbf16, #tpu.memory_space<vmem>>, vector<8x64xbf16>,
    return
  }
  func.func @transform_0(%arg0: i32) -> (i32, i32) {
    %c0_i32 = arith.constant 0 : i32
    %c0_i32_0 = arith.constant 0 : i32
    return %arg0, %c0_i32 : i32, i32
  }
  func.func @transform_1(%arg0: i32) -> (i32, i32) {
    %c0_i32 = arith.constant 0 : i32
    %c0_i32_0 = arith.constant 0 : i32
    %c0_i32_1 = arith.constant 0 : i32
    return %c0_i32, %c0_i32_0 : i32, i32
  }
  func.func @transform_2(%arg0: i32) -> (i32, i32) {
    %c0_i32 = arith.constant 0 : i32
    %c0_i32_0 = arith.constant 0 : i32
    %c0_i32_1 = arith.constant 0 : i32
    return %c0_i32, %c0_i32_0 : i32, i32
  }
  func.func @transform_3(%arg0: i32) -> (i32, i32) {
    %c0_i32 = arith.constant 0 : i32
    %c0_i32_0 = arith.constant 0 : i32
    return %arg0, %c0_i32 : i32, i32
  }
}

</mosaic_0001>

<bundles_post_ra>
// kernel: _forward.5
= control target key start
LH: loop header
LB: loop body
LE: loop exit
PB: predicated region body
PF: predicated region fallthrough
CT: control target
= control target key end

     0   :  { %s1631_s12 = smov 0   ;;  %s1926_s0 = inlined_call_operand.vmem [shape: bf16[2048,32], index: 0, kind: input, shape index: {}]   ;;  %s1927_s1 = inlined_call_operand.vmem [shape: bf16[32,8], index: 1, kind: input, shape index: {}]   ;;  %s1928_s2 = inlined_call_operand.vmem [shape: f32[1,8], index: 2, kind: input, shape index: {}]   ;;  %s1929_s3 = inlined_call_operand.vmem [shape: bf16[2048,8], index: 3, kind: output, shape index: {}]  }
   0x1 LB: > { %s1249_s13 = sadd.s32 4294967295, %s1609_s12   ;;  %p1253_p0 = scmp.ge.s32.totalorder %s1609_s12, 1  ;;  %s1609_s12 = sphi %s1631_s12, %s13_s12  }
   0x2   : > { %p138_p1 = scmp.lt.s32.totalorder %s1609_s12, 5 }
   0x4   : > { %p139_p2 = pnand %p1253_p0, %p138_p1 }
   0x5   : > { %s1254_s16 = sshll.u32 (!%p139_p2), %s1249_s13, 6 }
   0x6   : > { %142 = sbr.rel (%p139_p2) target bundleno = 283 (0x11b), region = 32  ;;  %p163_p3 = scmp.lt.s32.totalorder (!%p139_p2), %s1254_s16, 255 }
   0xb   : > { %v1569_v0 = vld [vmem:[%s1927_s1 + $0x8] sm:$0xff]   ;;  %v1570_v1 = vld [vmem:[%s1927_s1] sm:$0xff]   ;;  %s1931_s16 = smov (!%p163_p3, %s1254_s16), 255  ;;  %vm422_vm0 = vcmask 261120   ;;  %vm1128_vm1 = vcmask 60416  }
   0xc   : > { %1489 = vmatprep.subr.bf16.mxu0 %v1569_v0  ;;  %1557 = vmatprep.subr.bf16.mxu1 %v1569_v0  ;;  %s1255_s19 = sshll.u32 %s1931_s16, 2  ;;  %v1722_v34 = vld [vmem:[%s1928_s2] ss:$0 sm:$0xff] }
   0xd   : > { %1490 = vmatpush3.bf16.msra.mxu0 %v1569_v0  ;;  %1559 = vmatpush3.bf16.msra.mxu1 %v1569_v0  ;;  %s1653_s22 = scalar_lea.vmem %s1926_s0, %s1255_s19  ;;  %s1732_s27 = scalar_lea.vmem %s1929_s3, %s1255_s19 }
   0xe   : > { %1491 = vmatprep.subr.bf16.mxu0 %v1570_v1  ;;  %1558 = vmatprep.subr.bf16.mxu1 %v1570_v1  ;;  %v1571_v2 = vld [vmem:[%s1653_s22] sm:$0xff]   ;;  %v1573_v4 = vld [vmem:[%s1653_s22 + $0x8] sm:$0xff]   ;;  %v1575_v6 = vld [vmem:[%s1653_s22 + $0x10] sm:$0xff]  }
   0xf   : > { %v1572_v3 = vld [vmem:[%s1653_s22 + $0x80] sm:$0xff]   ;;  %1493 = vmatprep.mubr.msk.bf16.mxu0 %vm422_vm0, %v1571_v2  ;;  %v1574_v5 = vld [vmem:[%s1653_s22 + $0x88] sm:$0xff]   ;;  %v1576_v7 = vld [vmem:[%s1653_s22 + $0x90] sm:$0xff]  }
  0x10   : > { %1525 = vmatprep.mubr.msk.bf16.mxu1 %vm422_vm0, %v1572_v3  ;;  %v1577_v8 = vld [vmem:[%s1653_s22 + $0x18] sm:$0xff]   ;;  %v1579_v10 = vld [vmem:[%s1653_s22 + $0x20] sm:$0xff]   ;;  %v1581_v12 = vld [vmem:[%s1653_s22 + $0x28] sm:$0xff]  }
  0x11   : > { %1492 = vmatpush3.bf16.msra.mxu0 %v1570_v1  ;;  %1560 = vmatpush3.bf16.msra.mxu1 %v1570_v1  ;;  %v1578_v9 = vld [vmem:[%s1653_s22 + $0x98] sm:$0xff]   ;;  %v1580_v11 = vld [vmem:[%s1653_s22 + $0xa0] sm:$0xff]   ;;  %v1582_v13 = vld [vmem:[%s1653_s22 + $0xa8] sm:$0xff]  }
  0x12   : > { %v1583_v14 = vld [vmem:[%s1653_s22 + $0x30] sm:$0xff]   ;;  %v1585_v16 = vld [vmem:[%s1653_s22 + $0x38] sm:$0xff]   ;;  %v1587_v18 = vld [vmem:[%s1653_s22 + $0x40] sm:$0xff]  }
  0x13   : > { %v1584_v15 = vld [vmem:[%s1653_s22 + $0xb0] sm:$0xff]   ;;  %v1586_v17 = vld [vmem:[%s1653_s22 + $0xb8] sm:$0xff]   ;;  %v1588_v19 = vld [vmem:[%s1653_s22 + $0xc0] sm:$0xff]  }
  0x14   : > { %1494 = vmatmul.mubr.msk.bf16.vlgmr.msra.gmra.mxu0 %vm422_vm0, %v1573_v4  ;;  %1526 = vmatmul.mubr.msk.bf16.vlgmr.msra.gmra.mxu1 %vm422_vm0, %v1574_v5  ;;  %v1589_v20 = vld [vmem:[%s1653_s22 + $0x48] sm:$0xff]   ;;  %v1591_v22 = vld [vmem:[%s1653_s22 + $0x50] sm:$0xff]   ;;  %v1593_v24 = vld [vmem:[%s1653_s22 + $0x58] sm:$0xff]  }
  0x15   : > { %1497 = vmatprep.mubr.msk.bf16.mxu0 %vm422_vm0, %v1575_v6  ;;  %1529 = vmatprep.mubr.msk.bf16.mxu1 %vm422_vm0, %v1576_v7  ;;  %v1590_v21 = vld [vmem:[%s1653_s22 + $0xc8] sm:$0xff]   ;;  %v1592_v23 = vld [vmem:[%s1653_s22 + $0xd0] sm:$0xff]   ;;  %v1594_v25 = vld [vmem:[%s1653_s22 + $0xd8] sm:$0xff]  }
  0x16   : > { %v1595_v26 = vld [vmem:[%s1653_s22 + $0x60] sm:$0xff]   ;;  %v1597_v28 = vld [vmem:[%s1653_s22 + $0x68] sm:$0xff]   ;;  %v1599_v30 = vld [vmem:[%s1653_s22 + $0x70] sm:$0xff]  }
  0x17   : > { %v1596_v27 = vld [vmem:[%s1653_s22 + $0xe0] sm:$0xff]   ;;  %v1598_v29 = vld [vmem:[%s1653_s22 + $0xe8] sm:$0xff]   ;;  %v1600_v31 = vld [vmem:[%s1653_s22 + $0xf0] sm:$0xff]  }
  0x18   : > { %v1601_v32 = vld [vmem:[%s1653_s22 + $0x78] sm:$0xff]  }
  0x19   : > { %v1602_v33 = vld [vmem:[%s1653_s22 + $0xf8] sm:$0xff]  }
  0x1c   : > { %1498 = vmatmul.mubr.msk.bf16.gmra.mxu0 %vm422_vm0, %v1577_v8  ;;  %1530 = vmatmul.mubr.msk.bf16.gmra.mxu1 %vm422_vm0, %v1578_v9 }
  0x1d   : > { %1501 = vmatprep.mubr.msk.bf16.mxu0 %vm422_vm0, %v1579_v10  ;;  %1533 = vmatprep.mubr.msk.bf16.mxu1 %vm422_vm0, %v1580_v11 }
  0x24   : > { %1502 = vmatmul.mubr.msk.bf16.gmra.mxu0 %vm422_vm0, %v1581_v12  ;;  %1534 = vmatmul.mubr.msk.bf16.gmra.mxu1 %vm422_vm0, %v1582_v13 }
  0x25   : > { %1505 = vmatprep.mubr.msk.bf16.mxu0 %vm422_vm0, %v1583_v14  ;;  %1537 = vmatprep.mubr.msk.bf16.mxu1 %vm422_vm0, %v1584_v15 }
  0x2c   : > { %1506 = vmatmul.mubr.msk.bf16.gmra.mxu0 %vm422_vm0, %v1585_v16  ;;  %1538 = vmatmul.mubr.msk.bf16.gmra.mxu1 %vm422_vm0, %v1586_v17 }
  0x2d   : > { %1509 = vmatprep.mubr.msk.bf16.mxu0 %vm422_vm0, %v1587_v18  ;;  %1541 = vmatprep.mubr.msk.bf16.mxu1 %vm422_vm0, %v1588_v19 }
  0x34   : > { %1510 = vmatmul.mubr.msk.bf16.gmra.mxu0 %vm422_vm0, %v1589_v20  ;;  %1542 = vmatmul.mubr.msk.bf16.gmra.mxu1 %vm422_vm0, %v1590_v21 }
  0x35   : > { %1513 = vmatprep.mubr.msk.bf16.mxu0 %vm422_vm0, %v1591_v22  ;;  %1545 = vmatprep.mubr.msk.bf16.mxu1 %vm422_vm0, %v1592_v23 }
  0x3c   : > { %1514 = vmatmul.mubr.msk.bf16.gmra.mxu0 %vm422_vm0, %v1593_v24  ;;  %1546 = vmatmul.mubr.msk.bf16.gmra.mxu1 %vm422_vm0, %v1594_v25 }
  0x3d   : > { %1517 = vmatprep.mubr.msk.bf16.mxu0 %vm422_vm0, %v1595_v26  ;;  %1549 = vmatprep.mubr.msk.bf16.mxu1 %vm422_vm0, %v1596_v27 }
  0x44   : > { %1518 = vmatmul.mubr.msk.bf16.gmra.mxu0 %vm422_vm0, %v1597_v28  ;;  %1550 = vmatmul.mubr.msk.bf16.gmra.mxu1 %vm422_vm0, %v1598_v29 }
  0x45   : > { %1521 = vmatprep.mubr.msk.bf16.mxu0 %vm422_vm0, %v1599_v30  ;;  %1553 = vmatprep.mubr.msk.bf16.mxu1 %vm422_vm0, %v1600_v31 }
  0x4c   : > { %1522 = vmatmul.mubr.msk.bf16.gmra.mxu0 %vm422_vm0, %v1601_v32  ;;  %1554 = vmatmul.mubr.msk.bf16.gmra.mxu1 %vm422_vm0, %v1602_v33 }
  0xd4   : > { %v1495_v35 = vpop.f32.mrf.mxu0  ;;  %v1527_v37 = vpop.f32.mrf.mxu1 }
  0xd5   : > { %v562_v36 = vadd.f32 %v1495_v35, %v1722_v34  ;;  %v690_v38 = vadd.f32 %v1527_v37, %v1722_v34 }
  0xd6   : > { %v553_v39 = vpop.f32.mrf.mxu0  ;;  %v681_v42 = vpop.f32.mrf.mxu1 }
  0xd7   : > { %v810_v40 = vmax.f32 %v562_v36, 0.0  ;;  %v554_v41 = vadd.f32 %v1722_v34, %v553_v39  ;;  %v842_v43 = vmax.f32 %v690_v38, 0.0  ;;  %v682_v44 = vadd.f32 %v1722_v34, %v681_v42 }
  0xd8   : > { %v1496_v45 = vpop.f32.mrf.mxu0  ;;  %v1528_v49 = vpop.f32.mrf.mxu1 }
  0xd9   : > { %v1393_v46 = vpack.c.bf16 %v810_v40, %v810_v40  ;;  %v808_v47 = vmax.f32 %v554_v41, 0.0  ;;  %v565_v48 = vadd.f32 %v1496_v45, %v1722_v34  ;;  %v1425_v50 = vpack.c.bf16 %v842_v43, %v842_v43 }
  0xda   : > { %v840_v51 = vmax.f32 %v682_v44, 0.0  ;;  %v693_v52 = vadd.f32 %v1528_v49, %v1722_v34  ;;  %v556_v53 = vpop.f32.mrf.mxu0  ;;  %v684_v57 = vpop.f32.mrf.mxu1 }
  0xdb   : > { %1131 = vst.msk [vmem:[%s1732_s27 + $0x8] sm:$0xf] %vm1128_vm1, %v1393_v46  ;;  %v1391_v54 = vpack.c.bf16 %v808_v47, %v808_v47  ;;  %v811_v55 = vmax.f32 %v565_v48, 0.0  ;;  %v557_v56 = vadd.f32 %v1722_v34, %v556_v53  ;;  %1163 = vst.msk [vmem:[%s1732_s27 + $0x88] sm:$0xf] %vm1128_vm1, %v1425_v50  ;;  %v685_v60 = vadd.f32 %v1722_v34, %v684_v57 }
  0xdc   : > { %v1423_v58 = vpack.c.bf16 %v840_v51, %v840_v51  ;;  %v843_v59 = vmax.f32 %v693_v52, 0.0  ;;  %v1499_v61 = vpop.f32.mrf.mxu0  ;;  %v1531_v1 = vpop.f32.mrf.mxu1 }
  0xdd   : > { %1129 = vst.msk [vmem:[%s1732_s27] sm:$0xf] %vm1128_vm1, %v1391_v54  ;;  %v1394_v62 = vpack.c.bf16 %v811_v55, %v811_v55  ;;  %v809_v63 = vmax.f32 %v557_v56, 0.0  ;;  %v578_v0 = vadd.f32 %v1499_v61, %v1722_v34  ;;  %v841_v3 = vmax.f32 %v685_v60, 0.0 }
  0xde   : > { %1161 = vst.msk [vmem:[%s1732_s27 + $0x80] sm:$0xf] %vm1128_vm1, %v1423_v58  ;;  %v1426_v2 = vpack.c.bf16 %v843_v59, %v843_v59  ;;  %v706_v4 = vadd.f32 %v1531_v1, %v1722_v34  ;;  %v569_v5 = vpop.f32.mrf.mxu0  ;;  %v697_v9 = vpop.f32.mrf.mxu1 }
  0xdf   : > { %1132 = vst.msk [vmem:[%s1732_s27 + $0xc] sm:$0xf] %vm1128_vm1, %v1394_v62  ;;  %v1392_v6 = vpack.c.bf16 %v809_v63, %v809_v63  ;;  %v814_v7 = vmax.f32 %v578_v0, 0.0  ;;  %v570_v8 = vadd.f32 %v1722_v34, %v569_v5  ;;  %v1424_v10 = vpack.c.bf16 %v841_v3, %v841_v3 }
  0xe0   : > { %1164 = vst.msk [vmem:[%s1732_s27 + $0x8c] sm:$0xf] %vm1128_vm1, %v1426_v2  ;;  %v846_v11 = vmax.f32 %v706_v4, 0.0  ;;  %v698_v12 = vadd.f32 %v1722_v34, %v697_v9  ;;  %v1500_v13 = vpop.f32.mrf.mxu0  ;;  %v1532_v17 = vpop.f32.mrf.mxu1 }
  0xe1   : > { %1130 = vst.msk [vmem:[%s1732_s27 + $0x4] sm:$0xf] %vm1128_vm1, %v1392_v6  ;;  %v1397_v14 = vpack.c.bf16 %v814_v7, %v814_v7  ;;  %v812_v15 = vmax.f32 %v570_v8, 0.0  ;;  %v581_v16 = vadd.f32 %v1500_v13, %v1722_v34  ;;  %1162 = vst.msk [vmem:[%s1732_s27 + $0x84] sm:$0xf] %vm1128_vm1, %v1424_v10  ;;  %v709_v20 = vadd.f32 %v1532_v17, %v1722_v34 }
  0xe2   : > { %v1429_v18 = vpack.c.bf16 %v846_v11, %v846_v11  ;;  %v844_v19 = vmax.f32 %v698_v12, 0.0  ;;  %v572_v21 = vpop.f32.mrf.mxu0  ;;  %v700_v25 = vpop.f32.mrf.mxu1 }
  0xe3   : > { %1135 = vst.msk [vmem:[%s1732_s27 + $0x18] sm:$0xf] %vm1128_vm1, %v1397_v14  ;;  %v1395_v22 = vpack.c.bf16 %v812_v15, %v812_v15  ;;  %v815_v23 = vmax.f32 %v581_v16, 0.0  ;;  %v573_v24 = vadd.f32 %v1722_v34, %v572_v21  ;;  %v847_v27 = vmax.f32 %v709_v20, 0.0 }
  0xe4   : > { %1167 = vst.msk [vmem:[%s1732_s27 + $0x98] sm:$0xf] %vm1128_vm1, %v1429_v18  ;;  %v1427_v26 = vpack.c.bf16 %v844_v19, %v844_v19  ;;  %v701_v28 = vadd.f32 %v1722_v34, %v700_v25  ;;  %v1503_v29 = vpop.f32.mrf.mxu0  ;;  %v1535_v33 = vpop.f32.mrf.mxu1 }
  0xe5   : > { %1133 = vst.msk [vmem:[%s1732_s27 + $0x10] sm:$0xf] %vm1128_vm1, %v1395_v22  ;;  %v1398_v30 = vpack.c.bf16 %v815_v23, %v815_v23  ;;  %v813_v31 = vmax.f32 %v573_v24, 0.0  ;;  %v594_v32 = vadd.f32 %v1503_v29, %v1722_v34  ;;  %v1430_v35 = vpack.c.bf16 %v847_v27, %v847_v27 }
  0xe6   : > { %1165 = vst.msk [vmem:[%s1732_s27 + $0x90] sm:$0xf] %vm1128_vm1, %v1427_v26  ;;  %v845_v36 = vmax.f32 %v701_v28, 0.0  ;;  %v722_v37 = vadd.f32 %v1535_v33, %v1722_v34  ;;  %v585_v38 = vpop.f32.mrf.mxu0  ;;  %v713_v42 = vpop.f32.mrf.mxu1 }
  0xe7   : > { %1136 = vst.msk [vmem:[%s1732_s27 + $0x1c] sm:$0xf] %vm1128_vm1, %v1398_v30  ;;  %v1396_v39 = vpack.c.bf16 %v813_v31, %v813_v31  ;;  %v818_v40 = vmax.f32 %v594_v32, 0.0  ;;  %v586_v41 = vadd.f32 %v1722_v34, %v585_v38  ;;  %1168 = vst.msk [vmem:[%s1732_s27 + $0x9c] sm:$0xf] %vm1128_vm1, %v1430_v35  ;;  %v714_v45 = vadd.f32 %v1722_v34, %v713_v42 }
  0xe8   : > { %v1428_v43 = vpack.c.bf16 %v845_v36, %v845_v36  ;;  %v850_v44 = vmax.f32 %v722_v37, 0.0  ;;  %v1504_v46 = vpop.f32.mrf.mxu0  ;;  %v1536_v50 = vpop.f32.mrf.mxu1 }
  0xe9   : > { %1134 = vst.msk [vmem:[%s1732_s27 + $0x14] sm:$0xf] %vm1128_vm1, %v1396_v39  ;;  %v1401_v47 = vpack.c.bf16 %v818_v40, %v818_v40  ;;  %v816_v48 = vmax.f32 %v586_v41, 0.0  ;;  %v597_v49 = vadd.f32 %v1504_v46, %v1722_v34  ;;  %v848_v52 = vmax.f32 %v714_v45, 0.0 }
  0xea   : > { %1166 = vst.msk [vmem:[%s1732_s27 + $0x94] sm:$0xf] %vm1128_vm1, %v1428_v43  ;;  %v1433_v51 = vpack.c.bf16 %v850_v44, %v850_v44  ;;  %v725_v53 = vadd.f32 %v1536_v50, %v1722_v34  ;;  %v588_v54 = vpop.f32.mrf.mxu0  ;;  %v716_v58 = vpop.f32.mrf.mxu1 }
  0xeb   : > { %1139 = vst.msk [vmem:[%s1732_s27 + $0x28] sm:$0xf] %vm1128_vm1, %v1401_v47  ;;  %v1399_v55 = vpack.c.bf16 %v816_v48, %v816_v48  ;;  %v819_v56 = vmax.f32 %v597_v49, 0.0  ;;  %v589_v57 = vadd.f32 %v1722_v34, %v588_v54  ;;  %v1431_v59 = vpack.c.bf16 %v848_v52, %v848_v52 }
  0xec   : > { %1171 = vst.msk [vmem:[%s1732_s27 + $0xa8] sm:$0xf] %vm1128_vm1, %v1433_v51  ;;  %v851_v60 = vmax.f32 %v725_v53, 0.0  ;;  %v717_v61 = vadd.f32 %v1722_v34, %v716_v58  ;;  %v1507_v62 = vpop.f32.mrf.mxu0  ;;  %v1539_v2 = vpop.f32.mrf.mxu1 }
  0xed   : > { %1137 = vst.msk [vmem:[%s1732_s27 + $0x20] sm:$0xf] %vm1128_vm1, %v1399_v55  ;;  %v1402_v63 = vpack.c.bf16 %v819_v56, %v819_v56  ;;  %v817_v0 = vmax.f32 %v589_v57, 0.0  ;;  %v610_v1 = vadd.f32 %v1507_v62, %v1722_v34  ;;  %1169 = vst.msk [vmem:[%s1732_s27 + $0xa0] sm:$0xf] %vm1128_vm1, %v1431_v59  ;;  %v738_v5 = vadd.f32 %v1539_v2, %v1722_v34 }
  0xee   : > { %v1434_v3 = vpack.c.bf16 %v851_v60, %v851_v60  ;;  %v849_v4 = vmax.f32 %v717_v61, 0.0  ;;  %v601_v6 = vpop.f32.mrf.mxu0  ;;  %v729_v10 = vpop.f32.mrf.mxu1 }
  0xef   : > { %1140 = vst.msk [vmem:[%s1732_s27 + $0x2c] sm:$0xf] %vm1128_vm1, %v1402_v63  ;;  %v1400_v7 = vpack.c.bf16 %v817_v0, %v817_v0  ;;  %v822_v8 = vmax.f32 %v610_v1, 0.0  ;;  %v602_v9 = vadd.f32 %v1722_v34, %v601_v6  ;;  %v854_v12 = vmax.f32 %v738_v5, 0.0 }
  0xf0   : > { %1172 = vst.msk [vmem:[%s1732_s27 + $0xac] sm:$0xf] %vm1128_vm1, %v1434_v3  ;;  %v1432_v11 = vpack.c.bf16 %v849_v4, %v849_v4  ;;  %v730_v13 = vadd.f32 %v1722_v34, %v729_v10  ;;  %v1508_v14 = vpop.f32.mrf.mxu0  ;;  %v1540_v18 = vpop.f32.mrf.mxu1 }
  0xf1   : > { %1138 = vst.msk [vmem:[%s1732_s27 + $0x24] sm:$0xf] %vm1128_vm1, %v1400_v7  ;;  %v1405_v15 = vpack.c.bf16 %v822_v8, %v822_v8  ;;  %v820_v16 = vmax.f32 %v602_v9, 0.0  ;;  %v613_v17 = vadd.f32 %v1508_v14, %v1722_v34  ;;  %v1437_v19 = vpack.c.bf16 %v854_v12, %v854_v12 }
  0xf2   : > { %1170 = vst.msk [vmem:[%s1732_s27 + $0xa4] sm:$0xf] %vm1128_vm1, %v1432_v11  ;;  %v852_v20 = vmax.f32 %v730_v13, 0.0  ;;  %v741_v21 = vadd.f32 %v1540_v18, %v1722_v34  ;;  %v604_v22 = vpop.f32.mrf.mxu0  ;;  %v732_v26 = vpop.f32.mrf.mxu1 }
  0xf3   : > { %1143 = vst.msk [vmem:[%s1732_s27 + $0x38] sm:$0xf] %vm1128_vm1, %v1405_v15  ;;  %v1403_v23 = vpack.c.bf16 %v820_v16, %v820_v16  ;;  %v823_v24 = vmax.f32 %v613_v17, 0.0  ;;  %v605_v25 = vadd.f32 %v1722_v34, %v604_v22  ;;  %1175 = vst.msk [vmem:[%s1732_s27 + $0xb8] sm:$0xf] %vm1128_vm1, %v1437_v19  ;;  %v733_v29 = vadd.f32 %v1722_v34, %v732_v26 }
  0xf4   : > { %v1435_v27 = vpack.c.bf16 %v852_v20, %v852_v20  ;;  %v855_v28 = vmax.f32 %v741_v21, 0.0  ;;  %v1511_v30 = vpop.f32.mrf.mxu0  ;;  %v1543_v35 = vpop.f32.mrf.mxu1 }
  0xf5   : > { %1141 = vst.msk [vmem:[%s1732_s27 + $0x30] sm:$0xf] %vm1128_vm1, %v1403_v23  ;;  %v1406_v31 = vpack.c.bf16 %v823_v24, %v823_v24  ;;  %v821_v32 = vmax.f32 %v605_v25, 0.0  ;;  %v626_v33 = vadd.f32 %v1511_v30, %v1722_v34  ;;  %v853_v37 = vmax.f32 %v733_v29, 0.0 }
  0xf6   : > { %1173 = vst.msk [vmem:[%s1732_s27 + $0xb0] sm:$0xf] %vm1128_vm1, %v1435_v27  ;;  %v1438_v36 = vpack.c.bf16 %v855_v28, %v855_v28  ;;  %v754_v38 = vadd.f32 %v1543_v35, %v1722_v34  ;;  %v617_v39 = vpop.f32.mrf.mxu0  ;;  %v745_v43 = vpop.f32.mrf.mxu1 }
  0xf7   : > { %1144 = vst.msk [vmem:[%s1732_s27 + $0x3c] sm:$0xf] %vm1128_vm1, %v1406_v31  ;;  %v1404_v40 = vpack.c.bf16 %v821_v32, %v821_v32  ;;  %v826_v41 = vmax.f32 %v626_v33, 0.0  ;;  %v618_v42 = vadd.f32 %v1722_v34, %v617_v39  ;;  %v1436_v44 = vpack.c.bf16 %v853_v37, %v853_v37 }
  0xf8   : > { %1176 = vst.msk [vmem:[%s1732_s27 + $0xbc] sm:$0xf] %vm1128_vm1, %v1438_v36  ;;  %v858_v45 = vmax.f32 %v754_v38, 0.0  ;;  %v746_v46 = vadd.f32 %v1722_v34, %v745_v43  ;;  %v1512_v47 = vpop.f32.mrf.mxu0  ;;  %v1544_v51 = vpop.f32.mrf.mxu1 }
  0xf9   : > { %1142 = vst.msk [vmem:[%s1732_s27 + $0x34] sm:$0xf] %vm1128_vm1, %v1404_v40  ;;  %v1409_v48 = vpack.c.bf16 %v826_v41, %v826_v41  ;;  %v824_v49 = vmax.f32 %v618_v42, 0.0  ;;  %v629_v50 = vadd.f32 %v1512_v47, %v1722_v34  ;;  %1174 = vst.msk [vmem:[%s1732_s27 + $0xb4] sm:$0xf] %vm1128_vm1, %v1436_v44  ;;  %v757_v54 = vadd.f32 %v1544_v51, %v1722_v34 }
  0xfa   : > { %v1441_v52 = vpack.c.bf16 %v858_v45, %v858_v45  ;;  %v856_v53 = vmax.f32 %v746_v46, 0.0  ;;  %v620_v55 = vpop.f32.mrf.mxu0  ;;  %v748_v59 = vpop.f32.mrf.mxu1 }
  0xfb   : > { %1147 = vst.msk [vmem:[%s1732_s27 + $0x48] sm:$0xf] %vm1128_vm1, %v1409_v48  ;;  %v1407_v56 = vpack.c.bf16 %v824_v49, %v824_v49  ;;  %v827_v57 = vmax.f32 %v629_v50, 0.0  ;;  %v621_v58 = vadd.f32 %v1722_v34, %v620_v55  ;;  %v859_v61 = vmax.f32 %v757_v54, 0.0 }
  0xfc   : > { %1179 = vst.msk [vmem:[%s1732_s27 + $0xc8] sm:$0xf] %vm1128_vm1, %v1441_v52  ;;  %v1439_v60 = vpack.c.bf16 %v856_v53, %v856_v53  ;;  %v749_v62 = vadd.f32 %v1722_v34, %v748_v59  ;;  %v1515_v63 = vpop.f32.mrf.mxu0  ;;  %v1547_v3 = vpop.f32.mrf.mxu1 }
  0xfd   : > { %1145 = vst.msk [vmem:[%s1732_s27 + $0x40] sm:$0xf] %vm1128_vm1, %v1407_v56  ;;  %v1410_v0 = vpack.c.bf16 %v827_v57, %v827_v57  ;;  %v825_v1 = vmax.f32 %v621_v58, 0.0  ;;  %v642_v2 = vadd.f32 %v1515_v63, %v1722_v34  ;;  %v1442_v4 = vpack.c.bf16 %v859_v61, %v859_v61 }
  0xfe   : > { %1177 = vst.msk [vmem:[%s1732_s27 + $0xc0] sm:$0xf] %vm1128_vm1, %v1439_v60  ;;  %v857_v5 = vmax.f32 %v749_v62, 0.0  ;;  %v770_v6 = vadd.f32 %v1547_v3, %v1722_v34  ;;  %v633_v7 = vpop.f32.mrf.mxu0  ;;  %v761_v11 = vpop.f32.mrf.mxu1 }
  0xff   : > { %1148 = vst.msk [vmem:[%s1732_s27 + $0x4c] sm:$0xf] %vm1128_vm1, %v1410_v0  ;;  %v1408_v8 = vpack.c.bf16 %v825_v1, %v825_v1  ;;  %v830_v9 = vmax.f32 %v642_v2, 0.0  ;;  %v634_v10 = vadd.f32 %v1722_v34, %v633_v7  ;;  %1180 = vst.msk [vmem:[%s1732_s27 + $0xcc] sm:$0xf] %vm1128_vm1, %v1442_v4  ;;  %v762_v14 = vadd.f32 %v1722_v34, %v761_v11 }
 0x100   : > { %v1440_v12 = vpack.c.bf16 %v857_v5, %v857_v5  ;;  %v862_v13 = vmax.f32 %v770_v6, 0.0  ;;  %v1516_v15 = vpop.f32.mrf.mxu0  ;;  %v1548_v19 = vpop.f32.mrf.mxu1 }
 0x101   : > { %1146 = vst.msk [vmem:[%s1732_s27 + $0x44] sm:$0xf] %vm1128_vm1, %v1408_v8  ;;  %v1413_v16 = vpack.c.bf16 %v830_v9, %v830_v9  ;;  %v828_v17 = vmax.f32 %v634_v10, 0.0  ;;  %v645_v18 = vadd.f32 %v1516_v15, %v1722_v34  ;;  %v860_v21 = vmax.f32 %v762_v14, 0.0 }
 0x102   : > { %1178 = vst.msk [vmem:[%s1732_s27 + $0xc4] sm:$0xf] %vm1128_vm1, %v1440_v12  ;;  %v1445_v20 = vpack.c.bf16 %v862_v13, %v862_v13  ;;  %v773_v22 = vadd.f32 %v1548_v19, %v1722_v34  ;;  %v636_v23 = vpop.f32.mrf.mxu0  ;;  %v764_v27 = vpop.f32.mrf.mxu1 }
 0x103   : > { %1151 = vst.msk [vmem:[%s1732_s27 + $0x58] sm:$0xf] %vm1128_vm1, %v1413_v16  ;;  %v1411_v24 = vpack.c.bf16 %v828_v17, %v828_v17  ;;  %v831_v25 = vmax.f32 %v645_v18, 0.0  ;;  %v637_v26 = vadd.f32 %v1722_v34, %v636_v23  ;;  %v1443_v28 = vpack.c.bf16 %v860_v21, %v860_v21 }
 0x104   : > { %1183 = vst.msk [vmem:[%s1732_s27 + $0xd8] sm:$0xf] %vm1128_vm1, %v1445_v20  ;;  %v863_v29 = vmax.f32 %v773_v22, 0.0  ;;  %v765_v30 = vadd.f32 %v1722_v34, %v764_v27  ;;  %v1519_v31 = vpop.f32.mrf.mxu0  ;;  %v1551_v36 = vpop.f32.mrf.mxu1 }
 0x105   : > { %1149 = vst.msk [vmem:[%s1732_s27 + $0x50] sm:$0xf] %vm1128_vm1, %v1411_v24  ;;  %v1414_v32 = vpack.c.bf16 %v831_v25, %v831_v25  ;;  %v829_v33 = vmax.f32 %v637_v26, 0.0  ;;  %v658_v35 = vadd.f32 %v1519_v31, %v1722_v34  ;;  %1181 = vst.msk [vmem:[%s1732_s27 + $0xd0] sm:$0xf] %vm1128_vm1, %v1443_v28  ;;  %v786_v39 = vadd.f32 %v1551_v36, %v1722_v34 }
 0x106   : > { %v1446_v37 = vpack.c.bf16 %v863_v29, %v863_v29  ;;  %v861_v38 = vmax.f32 %v765_v30, 0.0  ;;  %v649_v40 = vpop.f32.mrf.mxu0  ;;  %v777_v44 = vpop.f32.mrf.mxu1 }
 0x107   : > { %1152 = vst.msk [vmem:[%s1732_s27 + $0x5c] sm:$0xf] %vm1128_vm1, %v1414_v32  ;;  %v1412_v41 = vpack.c.bf16 %v829_v33, %v829_v33  ;;  %v834_v42 = vmax.f32 %v658_v35, 0.0  ;;  %v650_v43 = vadd.f32 %v1722_v34, %v649_v40  ;;  %v866_v46 = vmax.f32 %v786_v39, 0.0 }
 0x108   : > { %1184 = vst.msk [vmem:[%s1732_s27 + $0xdc] sm:$0xf] %vm1128_vm1, %v1446_v37  ;;  %v1444_v45 = vpack.c.bf16 %v861_v38, %v861_v38  ;;  %v778_v47 = vadd.f32 %v1722_v34, %v777_v44  ;;  %v1520_v48 = vpop.f32.mrf.mxu0  ;;  %v1552_v52 = vpop.f32.mrf.mxu1 }
 0x109   : > { %1150 = vst.msk [vmem:[%s1732_s27 + $0x54] sm:$0xf] %vm1128_vm1, %v1412_v41  ;;  %v1417_v49 = vpack.c.bf16 %v834_v42, %v834_v42  ;;  %v832_v50 = vmax.f32 %v650_v43, 0.0  ;;  %v661_v51 = vadd.f32 %v1520_v48, %v1722_v34  ;;  %v1449_v53 = vpack.c.bf16 %v866_v46, %v866_v46 }
 0x10a   : > { %1182 = vst.msk [vmem:[%s1732_s27 + $0xd4] sm:$0xf] %vm1128_vm1, %v1444_v45  ;;  %v864_v54 = vmax.f32 %v778_v47, 0.0  ;;  %v789_v55 = vadd.f32 %v1552_v52, %v1722_v34  ;;  %v652_v56 = vpop.f32.mrf.mxu0  ;;  %v780_v60 = vpop.f32.mrf.mxu1 }
 0x10b   : > { %1155 = vst.msk [vmem:[%s1732_s27 + $0x68] sm:$0xf] %vm1128_vm1, %v1417_v49  ;;  %v1415_v57 = vpack.c.bf16 %v832_v50, %v832_v50  ;;  %v835_v58 = vmax.f32 %v661_v51, 0.0  ;;  %v653_v59 = vadd.f32 %v1722_v34, %v652_v56  ;;  %1187 = vst.msk [vmem:[%s1732_s27 + $0xe8] sm:$0xf] %vm1128_vm1, %v1449_v53  ;;  %v781_v63 = vadd.f32 %v1722_v34, %v780_v60 }
 0x10c   : > { %v1447_v61 = vpack.c.bf16 %v864_v54, %v864_v54  ;;  %v867_v62 = vmax.f32 %v789_v55, 0.0  ;;  %v1523_v0 = vpop.f32.mrf.mxu0  ;;  %v1555_v4 = vpop.f32.mrf.mxu1 }
 0x10d   : > { %1153 = vst.msk [vmem:[%s1732_s27 + $0x60] sm:$0xf] %vm1128_vm1, %v1415_v57  ;;  %v1418_v1 = vpack.c.bf16 %v835_v58, %v835_v58  ;;  %v833_v2 = vmax.f32 %v653_v59, 0.0  ;;  %v674_v3 = vadd.f32 %v1523_v0, %v1722_v34  ;;  %v865_v6 = vmax.f32 %v781_v63, 0.0 }
 0x10e   : > { %1185 = vst.msk [vmem:[%s1732_s27 + $0xe0] sm:$0xf] %vm1128_vm1, %v1447_v61  ;;  %v1450_v5 = vpack.c.bf16 %v867_v62, %v867_v62  ;;  %v802_v7 = vadd.f32 %v1555_v4, %v1722_v34  ;;  %v665_v8 = vpop.f32.mrf.mxu0  ;;  %v793_v12 = vpop.f32.mrf.mxu1 }
 0x10f   : > { %1156 = vst.msk [vmem:[%s1732_s27 + $0x6c] sm:$0xf] %vm1128_vm1, %v1418_v1  ;;  %v1416_v9 = vpack.c.bf16 %v833_v2, %v833_v2  ;;  %v838_v10 = vmax.f32 %v674_v3, 0.0  ;;  %v666_v11 = vadd.f32 %v1722_v34, %v665_v8  ;;  %v1448_v13 = vpack.c.bf16 %v865_v6, %v865_v6 }
 0x110   : > { %1188 = vst.msk [vmem:[%s1732_s27 + $0xec] sm:$0xf] %vm1128_vm1, %v1450_v5  ;;  %v870_v14 = vmax.f32 %v802_v7, 0.0  ;;  %v794_v15 = vadd.f32 %v1722_v34, %v793_v12  ;;  %v1524_v16 = vpop.f32.mrf.mxu0  ;;  %v1556_v20 = vpop.f32.mrf.mxu1 }
 0x111   : > { %1154 = vst.msk [vmem:[%s1732_s27 + $0x64] sm:$0xf] %vm1128_vm1, %v1416_v9  ;;  %v1421_v17 = vpack.c.bf16 %v838_v10, %v838_v10  ;;  %v836_v18 = vmax.f32 %v666_v11, 0.0  ;;  %v677_v19 = vadd.f32 %v1524_v16, %v1722_v34  ;;  %1186 = vst.msk [vmem:[%s1732_s27 + $0xe4] sm:$0xf] %vm1128_vm1, %v1448_v13  ;;  %v805_v23 = vadd.f32 %v1556_v20, %v1722_v34 }
 0x112   : > { %v1453_v21 = vpack.c.bf16 %v870_v14, %v870_v14  ;;  %v868_v22 = vmax.f32 %v794_v15, 0.0  ;;  %v668_v24 = vpop.f32.mrf.mxu0  ;;  %v796_v28 = vpop.f32.mrf.mxu1 }
 0x113   : > { %1159 = vst.msk [vmem:[%s1732_s27 + $0x78] sm:$0xf] %vm1128_vm1, %v1421_v17  ;;  %v1419_v25 = vpack.c.bf16 %v836_v18, %v836_v18  ;;  %v839_v26 = vmax.f32 %v677_v19, 0.0  ;;  %v669_v27 = vadd.f32 %v1722_v34, %v668_v24  ;;  %v871_v30 = vmax.f32 %v805_v23, 0.0 }
 0x114   : > { %1191 = vst.msk [vmem:[%s1732_s27 + $0xf8] sm:$0xf] %vm1128_vm1, %v1453_v21  ;;  %v1451_v29 = vpack.c.bf16 %v868_v22, %v868_v22  ;;  %v797_v31 = vadd.f32 %v1722_v34, %v796_v28 }
 0x115   : > { %1157 = vst.msk [vmem:[%s1732_s27 + $0x70] sm:$0xf] %vm1128_vm1, %v1419_v25  ;;  %v1422_v32 = vpack.c.bf16 %v839_v26, %v839_v26  ;;  %v837_v33 = vmax.f32 %v669_v27, 0.0  ;;  %v1454_v35 = vpack.c.bf16 %v871_v30, %v871_v30 }
 0x116   : > { %1189 = vst.msk [vmem:[%s1732_s27 + $0xf0] sm:$0xf] %vm1128_vm1, %v1451_v29  ;;  %v869_v36 = vmax.f32 %v797_v31, 0.0 }
 0x117   : > { %1160 = vst.msk [vmem:[%s1732_s27 + $0x7c] sm:$0xf] %vm1128_vm1, %v1422_v32  ;;  %v1420_v37 = vpack.c.bf16 %v837_v33, %v837_v33  ;;  %1192 = vst.msk [vmem:[%s1732_s27 + $0xfc] sm:$0xf] %vm1128_vm1, %v1454_v35 }
 0x118   : > { %v1452_v38 = vpack.c.bf16 %v869_v36, %v869_v36 }
 0x119   : > { %1158 = vst.msk [vmem:[%s1732_s27 + $0x74] sm:$0xf] %vm1128_vm1, %v1420_v37 }
 0x11a   : > { %1190 = vst.msk [vmem:[%s1732_s27 + $0xf4] sm:$0xf] %vm1128_vm1, %v1452_v38 }
 0x11b PF: > { %s13_s12 = sadd.s32 1, %s1609_s12  }
 0x11c   : > { %p10_p4 = scmp.ge.s32.totalorder %s13_s12, 6  }
 0x11e   :  { %12 = sbr.rel (!%p10_p4) target bundleno = 1 (0x1), region = 62 }

// kernel: _forward.6
= control target key start
LH: loop header
LB: loop body
LE: loop exit
PB: predicated region body
PF: predicated region fallthrough
CT: control target
= control target key end

     0   :  { %s1036_s12 = smov 0   ;;  %s1212_s0 = inlined_call_operand.vmem [shape: bf16[512,80], index: 0, kind: input, shape index: {}]   ;;  %s1213_s1 = inlined_call_operand.vmem [shape: bf16[80,8], index: 1, kind: input, shape index: {}]   ;;  %s1214_s2 = inlined_call_operand.vmem [shape: f32[1,8], index: 2, kind: input, shape index: {}]   ;;  %s1215_s3 = inlined_call_operand.vmem [shape: bf16[512,8], index: 3, kind: output, shape index: {}]  }
   0x1 LB: > { %s793_s13 = sadd.s32 4294967295, %s1014_s12   ;;  %p797_p0 = scmp.ge.s32.totalorder %s1014_s12, 1  ;;  %s1014_s12 = sphi %s1036_s12, %s13_s12  }
   0x2   : > { %p138_p1 = scmp.lt.s32.totalorder %s1014_s12, 3 }
   0x4   : > { %p139_p2 = pnand %p797_p0, %p138_p1 }
   0x5   : > { %s798_s16 = sshll.u32 (!%p139_p2), %s793_s13, 5 }
   0x6   : > { %142 = sbr.rel (%p139_p2) target bundleno = 263 (0x107), region = 32  ;;  %p163_p3 = scmp.lt.s32.totalorder (!%p139_p2), %s798_s16, 63 }
   0xb   : > { %v987_v0 = vld [vmem:[%s1213_s1 + $0x20] sm:$0xff]   ;;  %v988_v1 = vld [vmem:[%s1213_s1 + $0x18] sm:$0xff]   ;;  %s1217_s16 = smov (!%p163_p3, %s798_s16), 63  ;;  %v989_v2 = vld [vmem:[%s1213_s1 + $0x10] sm:$0xff]   ;;  %vm334_vm0 = vcmask 654336   ;;  %vm704_vm1 = vcmask 60416  }
   0xc   : > { %927 = vmatprep.subr.bf16.mxu0 %v987_v0  ;;  %969 = vmatprep.subr.bf16.mxu1 %v987_v0  ;;  %s799_s21 = sshll.u32 %s1217_s16, 2  ;;  %v990_v3 = vld [vmem:[%s1213_s1 + $0x8] sm:$0xff]   ;;  %v991_v6 = vld [vmem:[%s1213_s1] sm:$0xff]  }
   0xd   : > { %928 = vmatpush3.bf16.msra.mxu0 %v987_v0  ;;  %974 = vmatpush3.bf16.msra.mxu1 %v987_v0  ;;  %s1064_s26 = scalar_lea.vmem %s1212_s0, %s799_s21  ;;  %v1104_v21 = vld [vmem:[%s1214_s2] ss:$0 sm:$0xff]  ;;  %s1115_s6 = scalar_lea.vmem %s1215_s3, %s799_s21 }
   0xe   : > { %929 = vmatprep.subr.bf16.mxu0 %v988_v1  ;;  %970 = vmatprep.subr.bf16.mxu1 %v988_v1  ;;  %v992_v4 = vld [vmem:[%s1064_s26] sm:$0xff]   ;;  %v994_v7 = vld [vmem:[%s1064_s26 + $0x8] sm:$0xff]   ;;  %v996_v9 = vld [vmem:[%s1064_s26 + $0x10] sm:$0xff]  }
   0xf   : > { %v993_v5 = vld [vmem:[%s1064_s26 + $0x40] sm:$0xff]   ;;  %937 = vmatprep.mubr.msk.bf16.mxu0 %vm334_vm0, %v992_v4  ;;  %v995_v8 = vld [vmem:[%s1064_s26 + $0x48] sm:$0xff]   ;;  %v997_v10 = vld [vmem:[%s1064_s26 + $0x50] sm:$0xff]  }
  0x10   : > { %953 = vmatprep.mubr.msk.bf16.mxu1 %vm334_vm0, %v993_v5  ;;  %v998_v11 = vld [vmem:[%s1064_s26 + $0x18] sm:$0xff]   ;;  %v1000_v13 = vld [vmem:[%s1064_s26 + $0x20] sm:$0xff]   ;;  %v1002_v15 = vld [vmem:[%s1064_s26 + $0x28] sm:$0xff]  }
  0x11   : > { %930 = vmatpush3.bf16.msra.mxu0 %v988_v1  ;;  %975 = vmatpush3.bf16.msra.mxu1 %v988_v1  ;;  %v999_v12 = vld [vmem:[%s1064_s26 + $0x58] sm:$0xff]   ;;  %v1001_v14 = vld [vmem:[%s1064_s26 + $0x60] sm:$0xff]   ;;  %v1003_v16 = vld [vmem:[%s1064_s26 + $0x68] sm:$0xff]  }
  0x12   : > { %931 = vmatprep.subr.bf16.mxu0 %v989_v2  ;;  %971 = vmatprep.subr.bf16.mxu1 %v989_v2  ;;  %v1004_v17 = vld [vmem:[%s1064_s26 + $0x30] sm:$0xff]   ;;  %v1006_v19 = vld [vmem:[%s1064_s26 + $0x38] sm:$0xff]  }
  0x13   : > { %v1005_v18 = vld [vmem:[%s1064_s26 + $0x70] sm:$0xff]   ;;  %v1007_v20 = vld [vmem:[%s1064_s26 + $0x78] sm:$0xff]  }
  0x15   : > { %932 = vmatpush3.bf16.msra.mxu0 %v989_v2  ;;  %976 = vmatpush3.bf16.msra.mxu1 %v989_v2 }
  0x16   : > { %933 = vmatprep.subr.bf16.mxu0 %v990_v3  ;;  %972 = vmatprep.subr.bf16.mxu1 %v990_v3 }
  0x19   : > { %934 = vmatpush3.bf16.msra.mxu0 %v990_v3  ;;  %977 = vmatpush3.bf16.msra.mxu1 %v990_v3 }
  0x1a   : > { %935 = vmatprep.subr.bf16.mxu0 %v991_v6  ;;  %973 = vmatprep.subr.bf16.mxu1 %v991_v6 }
  0x1d   : > { %936 = vmatpush3.bf16.msra.mxu0 %v991_v6  ;;  %978 = vmatpush3.bf16.msra.mxu1 %v991_v6 }
  0x20   : > { %938 = vmatmul.mubr.msk.bf16.vlgmr.msra.gmra.mxu0 %vm334_vm0, %v994_v7  ;;  %954 = vmatmul.mubr.msk.bf16.vlgmr.msra.gmra.mxu1 %vm334_vm0, %v995_v8 }
  0x21   : > { %941 = vmatprep.mubr.msk.bf16.mxu0 %vm334_vm0, %v996_v9  ;;  %957 = vmatprep.mubr.msk.bf16.mxu1 %vm334_vm0, %v997_v10 }
  0x28   : > { %942 = vmatmul.mubr.msk.bf16.gmra.mxu0 %vm334_vm0, %v998_v11  ;;  %958 = vmatmul.mubr.msk.bf16.gmra.mxu1 %vm334_vm0, %v999_v12 }
  0x29   : > { %945 = vmatprep.mubr.msk.bf16.mxu0 %vm334_vm0, %v1000_v13  ;;  %961 = vmatprep.mubr.msk.bf16.mxu1 %vm334_vm0, %v1001_v14 }
  0x30   : > { %946 = vmatmul.mubr.msk.bf16.gmra.mxu0 %vm334_vm0, %v1002_v15  ;;  %962 = vmatmul.mubr.msk.bf16.gmra.mxu1 %vm334_vm0, %v1003_v16 }
  0x31   : > { %949 = vmatprep.mubr.msk.bf16.mxu0 %vm334_vm0, %v1004_v17  ;;  %965 = vmatprep.mubr.msk.bf16.mxu1 %vm334_vm0, %v1005_v18 }
  0x38   : > { %950 = vmatmul.mubr.msk.bf16.gmra.mxu0 %vm334_vm0, %v1006_v19  ;;  %966 = vmatmul.mubr.msk.bf16.gmra.mxu1 %vm334_vm0, %v1007_v20 }
  0xe0   : > { %v939_v22 = vpop.f32.mrf.mxu0  ;;  %v955_v23 = vpop.f32.mrf.mxu1 }
  0xe1   : > { %v426_v24 = vadd.f32 %v939_v22, %v1104_v21  ;;  %v490_v25 = vadd.f32 %v955_v23, %v1104_v21 }
  0xe2   : > { %v417_v26 = vpop.f32.mrf.mxu0  ;;  %v481_v27 = vpop.f32.mrf.mxu1 }
  0xe3   : > { %v546_v28 = vmax.f32 %v426_v24, 0.0  ;;  %v562_v29 = vmax.f32 %v490_v25, 0.0  ;;  %v418_v30 = vadd.f32 %v1104_v21, %v417_v26  ;;  %v482_v31 = vadd.f32 %v1104_v21, %v481_v27 }
  0xe4   : > { %v940_v32 = vpop.f32.mrf.mxu0  ;;  %v956_v33 = vpop.f32.mrf.mxu1 }
  0xe5   : > { %v876_v34 = vpack.c.bf16 %v546_v28, %v546_v28  ;;  %v892_v35 = vpack.c.bf16 %v562_v29, %v562_v29  ;;  %v544_v36 = vmax.f32 %v418_v30, 0.0  ;;  %v560_v37 = vmax.f32 %v482_v31, 0.0 }
  0xe6   : > { %v429_v38 = vadd.f32 %v940_v32, %v1104_v21  ;;  %v493_v39 = vadd.f32 %v956_v33, %v1104_v21  ;;  %v420_v40 = vpop.f32.mrf.mxu0  ;;  %v484_v41 = vpop.f32.mrf.mxu1 }
  0xe7   : > { %707 = vst.msk [vmem:[%s1115_s6 + $0x8] sm:$0xf] %vm704_vm1, %v876_v34  ;;  %723 = vst.msk [vmem:[%s1115_s6 + $0x48] sm:$0xf] %vm704_vm1, %v892_v35  ;;  %v874_v42 = vpack.c.bf16 %v544_v36, %v544_v36  ;;  %v890_v43 = vpack.c.bf16 %v560_v37, %v560_v37  ;;  %v421_v44 = vadd.f32 %v1104_v21, %v420_v40 }
  0xe8   : > { %v485_v45 = vadd.f32 %v1104_v21, %v484_v41  ;;  %v547_v46 = vmax.f32 %v429_v38, 0.0  ;;  %v563_v47 = vmax.f32 %v493_v39, 0.0  ;;  %v943_v48 = vpop.f32.mrf.mxu0  ;;  %v959_v49 = vpop.f32.mrf.mxu1 }
  0xe9   : > { %705 = vst.msk [vmem:[%s1115_s6] sm:$0xf] %vm704_vm1, %v874_v42  ;;  %721 = vst.msk [vmem:[%s1115_s6 + $0x40] sm:$0xf] %vm704_vm1, %v890_v43  ;;  %v545_v50 = vmax.f32 %v421_v44, 0.0  ;;  %v442_v52 = vadd.f32 %v943_v48, %v1104_v21  ;;  %v506_v53 = vadd.f32 %v959_v49, %v1104_v21 }
  0xea   : > { %v561_v51 = vmax.f32 %v485_v45, 0.0  ;;  %v877_v54 = vpack.c.bf16 %v547_v46, %v547_v46  ;;  %v893_v55 = vpack.c.bf16 %v563_v47, %v563_v47  ;;  %v433_v56 = vpop.f32.mrf.mxu0  ;;  %v497_v57 = vpop.f32.mrf.mxu1 }
  0xeb   : > { %v875_v58 = vpack.c.bf16 %v545_v50, %v545_v50  ;;  %v550_v60 = vmax.f32 %v442_v52, 0.0  ;;  %v566_v61 = vmax.f32 %v506_v53, 0.0  ;;  %v434_v62 = vadd.f32 %v1104_v21, %v433_v56 }
  0xec   : > { %v891_v59 = vpack.c.bf16 %v561_v51, %v561_v51  ;;  %708 = vst.msk [vmem:[%s1115_s6 + $0xc] sm:$0xf] %vm704_vm1, %v877_v54  ;;  %724 = vst.msk [vmem:[%s1115_s6 + $0x4c] sm:$0xf] %vm704_vm1, %v893_v55  ;;  %v498_v63 = vadd.f32 %v1104_v21, %v497_v57  ;;  %v944_v0 = vpop.f32.mrf.mxu0  ;;  %v960_v1 = vpop.f32.mrf.mxu1 }
  0xed   : > { %706 = vst.msk [vmem:[%s1115_s6 + $0x4] sm:$0xf] %vm704_vm1, %v875_v58  ;;  %v880_v2 = vpack.c.bf16 %v550_v60, %v550_v60  ;;  %v896_v3 = vpack.c.bf16 %v566_v61, %v566_v61  ;;  %v445_v4 = vadd.f32 %v944_v0, %v1104_v21  ;;  %v509_v5 = vadd.f32 %v960_v1, %v1104_v21 }
  0xee   : > { %722 = vst.msk [vmem:[%s1115_s6 + $0x44] sm:$0xf] %vm704_vm1, %v891_v59  ;;  %v548_v6 = vmax.f32 %v434_v62, 0.0  ;;  %v564_v7 = vmax.f32 %v498_v63, 0.0  ;;  %v436_v8 = vpop.f32.mrf.mxu0  ;;  %v500_v9 = vpop.f32.mrf.mxu1 }
  0xef   : > { %711 = vst.msk [vmem:[%s1115_s6 + $0x18] sm:$0xf] %vm704_vm1, %v880_v2  ;;  %727 = vst.msk [vmem:[%s1115_s6 + $0x58] sm:$0xf] %vm704_vm1, %v896_v3  ;;  %v551_v10 = vmax.f32 %v445_v4, 0.0  ;;  %v567_v11 = vmax.f32 %v509_v5, 0.0  ;;  %v437_v12 = vadd.f32 %v1104_v21, %v436_v8  ;;  %v501_v13 = vadd.f32 %v1104_v21, %v500_v9 }
  0xf0   : > { %v878_v14 = vpack.c.bf16 %v548_v6, %v548_v6  ;;  %v894_v15 = vpack.c.bf16 %v564_v7, %v564_v7  ;;  %v947_v16 = vpop.f32.mrf.mxu0  ;;  %v963_v17 = vpop.f32.mrf.mxu1 }
  0xf1   : > { %v881_v18 = vpack.c.bf16 %v551_v10, %v551_v10  ;;  %v897_v19 = vpack.c.bf16 %v567_v11, %v567_v11  ;;  %v549_v20 = vmax.f32 %v437_v12, 0.0  ;;  %v565_v22 = vmax.f32 %v501_v13, 0.0 }
  0xf2   : > { %709 = vst.msk [vmem:[%s1115_s6 + $0x10] sm:$0xf] %vm704_vm1, %v878_v14  ;;  %725 = vst.msk [vmem:[%s1115_s6 + $0x50] sm:$0xf] %vm704_vm1, %v894_v15  ;;  %v458_v23 = vadd.f32 %v947_v16, %v1104_v21  ;;  %v522_v24 = vadd.f32 %v963_v17, %v1104_v21  ;;  %v449_v25 = vpop.f32.mrf.mxu0  ;;  %v513_v26 = vpop.f32.mrf.mxu1 }
  0xf3   : > { %712 = vst.msk [vmem:[%s1115_s6 + $0x1c] sm:$0xf] %vm704_vm1, %v881_v18  ;;  %728 = vst.msk [vmem:[%s1115_s6 + $0x5c] sm:$0xf] %vm704_vm1, %v897_v19  ;;  %v879_v27 = vpack.c.bf16 %v549_v20, %v549_v20  ;;  %v895_v28 = vpack.c.bf16 %v565_v22, %v565_v22  ;;  %v450_v29 = vadd.f32 %v1104_v21, %v449_v25 }
  0xf4   : > { %v514_v30 = vadd.f32 %v1104_v21, %v513_v26  ;;  %v554_v31 = vmax.f32 %v458_v23, 0.0  ;;  %v570_v32 = vmax.f32 %v522_v24, 0.0  ;;  %v948_v33 = vpop.f32.mrf.mxu0  ;;  %v964_v34 = vpop.f32.mrf.mxu1 }
  0xf5   : > { %710 = vst.msk [vmem:[%s1115_s6 + $0x14] sm:$0xf] %vm704_vm1, %v879_v27  ;;  %726 = vst.msk [vmem:[%s1115_s6 + $0x54] sm:$0xf] %vm704_vm1, %v895_v28  ;;  %v552_v35 = vmax.f32 %v450_v29, 0.0  ;;  %v461_v37 = vadd.f32 %v948_v33, %v1104_v21  ;;  %v525_v38 = vadd.f32 %v964_v34, %v1104_v21 }
  0xf6   : > { %v568_v36 = vmax.f32 %v514_v30, 0.0  ;;  %v884_v39 = vpack.c.bf16 %v554_v31, %v554_v31  ;;  %v900_v40 = vpack.c.bf16 %v570_v32, %v570_v32  ;;  %v452_v41 = vpop.f32.mrf.mxu0  ;;  %v516_v42 = vpop.f32.mrf.mxu1 }
  0xf7   : > { %v882_v43 = vpack.c.bf16 %v552_v35, %v552_v35  ;;  %v555_v45 = vmax.f32 %v461_v37, 0.0  ;;  %v571_v46 = vmax.f32 %v525_v38, 0.0  ;;  %v453_v47 = vadd.f32 %v1104_v21, %v452_v41 }
  0xf8   : > { %v898_v44 = vpack.c.bf16 %v568_v36, %v568_v36  ;;  %715 = vst.msk [vmem:[%s1115_s6 + $0x28] sm:$0xf] %vm704_vm1, %v884_v39  ;;  %731 = vst.msk [vmem:[%s1115_s6 + $0x68] sm:$0xf] %vm704_vm1, %v900_v40  ;;  %v517_v48 = vadd.f32 %v1104_v21, %v516_v42  ;;  %v951_v49 = vpop.f32.mrf.mxu0  ;;  %v967_v50 = vpop.f32.mrf.mxu1 }
  0xf9   : > { %713 = vst.msk [vmem:[%s1115_s6 + $0x20] sm:$0xf] %vm704_vm1, %v882_v43  ;;  %v885_v51 = vpack.c.bf16 %v555_v45, %v555_v45  ;;  %v901_v52 = vpack.c.bf16 %v571_v46, %v571_v46  ;;  %v474_v53 = vadd.f32 %v951_v49, %v1104_v21  ;;  %v538_v54 = vadd.f32 %v967_v50, %v1104_v21 }
  0xfa   : > { %729 = vst.msk [vmem:[%s1115_s6 + $0x60] sm:$0xf] %vm704_vm1, %v898_v44  ;;  %v553_v55 = vmax.f32 %v453_v47, 0.0  ;;  %v569_v56 = vmax.f32 %v517_v48, 0.0  ;;  %v465_v57 = vpop.f32.mrf.mxu0  ;;  %v529_v58 = vpop.f32.mrf.mxu1 }
  0xfb   : > { %716 = vst.msk [vmem:[%s1115_s6 + $0x2c] sm:$0xf] %vm704_vm1, %v885_v51  ;;  %732 = vst.msk [vmem:[%s1115_s6 + $0x6c] sm:$0xf] %vm704_vm1, %v901_v52  ;;  %v558_v59 = vmax.f32 %v474_v53, 0.0  ;;  %v574_v60 = vmax.f32 %v538_v54, 0.0  ;;  %v466_v61 = vadd.f32 %v1104_v21, %v465_v57  ;;  %v530_v62 = vadd.f32 %v1104_v21, %v529_v58 }
  0xfc   : > { %v883_v63 = vpack.c.bf16 %v553_v55, %v553_v55  ;;  %v899_v0 = vpack.c.bf16 %v569_v56, %v569_v56  ;;  %v952_v1 = vpop.f32.mrf.mxu0  ;;  %v968_v2 = vpop.f32.mrf.mxu1 }
  0xfd   : > { %v888_v3 = vpack.c.bf16 %v558_v59, %v558_v59  ;;  %v904_v4 = vpack.c.bf16 %v574_v60, %v574_v60  ;;  %v556_v5 = vmax.f32 %v466_v61, 0.0  ;;  %v572_v6 = vmax.f32 %v530_v62, 0.0 }
  0xfe   : > { %714 = vst.msk [vmem:[%s1115_s6 + $0x24] sm:$0xf] %vm704_vm1, %v883_v63  ;;  %730 = vst.msk [vmem:[%s1115_s6 + $0x64] sm:$0xf] %vm704_vm1, %v899_v0  ;;  %v477_v7 = vadd.f32 %v952_v1, %v1104_v21  ;;  %v541_v8 = vadd.f32 %v968_v2, %v1104_v21  ;;  %v468_v9 = vpop.f32.mrf.mxu0  ;;  %v532_v10 = vpop.f32.mrf.mxu1 }
  0xff   : > { %719 = vst.msk [vmem:[%s1115_s6 + $0x38] sm:$0xf] %vm704_vm1, %v888_v3  ;;  %735 = vst.msk [vmem:[%s1115_s6 + $0x78] sm:$0xf] %vm704_vm1, %v904_v4  ;;  %v886_v11 = vpack.c.bf16 %v556_v5, %v556_v5  ;;  %v902_v12 = vpack.c.bf16 %v572_v6, %v572_v6  ;;  %v469_v13 = vadd.f32 %v1104_v21, %v468_v9 }
 0x100   : > { %v533_v14 = vadd.f32 %v1104_v21, %v532_v10  ;;  %v559_v15 = vmax.f32 %v477_v7, 0.0  ;;  %v575_v16 = vmax.f32 %v541_v8, 0.0 }
 0x101   : > { %717 = vst.msk [vmem:[%s1115_s6 + $0x30] sm:$0xf] %vm704_vm1, %v886_v11  ;;  %733 = vst.msk [vmem:[%s1115_s6 + $0x70] sm:$0xf] %vm704_vm1, %v902_v12  ;;  %v557_v17 = vmax.f32 %v469_v13, 0.0 }
 0x102   : > { %v573_v18 = vmax.f32 %v533_v14, 0.0  ;;  %v889_v19 = vpack.c.bf16 %v559_v15, %v559_v15  ;;  %v905_v20 = vpack.c.bf16 %v575_v16, %v575_v16 }
 0x103   : > { %v887_v22 = vpack.c.bf16 %v557_v17, %v557_v17 }
 0x104   : > { %v903_v23 = vpack.c.bf16 %v573_v18, %v573_v18  ;;  %720 = vst.msk [vmem:[%s1115_s6 + $0x3c] sm:$0xf] %vm704_vm1, %v889_v19  ;;  %736 = vst.msk [vmem:[%s1115_s6 + $0x7c] sm:$0xf] %vm704_vm1, %v905_v20 }
 0x105   : > { %718 = vst.msk [vmem:[%s1115_s6 + $0x34] sm:$0xf] %vm704_vm1, %v887_v22 }
 0x106   : > { %734 = vst.msk [vmem:[%s1115_s6 + $0x74] sm:$0xf] %vm704_vm1, %v903_v23 }
 0x107 PF: > { %s13_s12 = sadd.s32 1, %s1014_s12  }
 0x108   : > { %p10_p4 = scmp.ge.s32.totalorder %s13_s12, 4  }
 0x10a   :  { %12 = sbr.rel (!%p10_p4) target bundleno = 1 (0x1), region = 62 }

// kernel: _forward.7
= control target key start
LH: loop header
LB: loop body
LE: loop exit
PB: predicated region body
PF: predicated region fallthrough
CT: control target
= control target key end

     0   :  { %s556_s12 = smov 0   ;;  %s620_s0 = inlined_call_operand.vmem [shape: bf16[128,80], index: 0, kind: input, shape index: {}]   ;;  %s621_s1 = inlined_call_operand.vmem [shape: bf16[80,16], index: 1, kind: input, shape index: {}]   ;;  %s622_s2 = inlined_call_operand.vmem [shape: f32[1,16], index: 2, kind: input, shape index: {}]   ;;  %s623_s3 = inlined_call_operand.vmem [shape: bf16[128,16], index: 3, kind: output, shape index: {}]  }
   0x1 LB: > { %s433_s13 = sadd.s32 4294967295, %s534_s12   ;;  %p437_p0 = scmp.ge.s32.totalorder %s534_s12, 1  ;;  %s534_s12 = sphi %s556_s12, %s13_s12  }
   0x2   : > { %p138_p1 = scmp.lt.s32.totalorder %s534_s12, 3 }
   0x4   : > { %p139_p2 = pnand %p437_p0, %p138_p1 }
   0x5   : > { %s438_s16 = sshll.u32 (!%p139_p2), %s433_s13, 3 }
   0x6   : > { %142 = sbr.rel (%p139_p2) target bundleno = 239 (0xef), region = 32  ;;  %p163_p3 = scmp.lt.s32.totalorder (!%p139_p2), %s438_s16, 15 }
   0xb   : > { %v519_v0 = vld [vmem:[%s621_s1 + $0x20] sm:$0xff]   ;;  %v520_v1 = vld [vmem:[%s621_s1 + $0x18] sm:$0xff]   ;;  %s625_s16 = smov (!%p163_p3, %s438_s16), 15  ;;  %v521_v2 = vld [vmem:[%s621_s1 + $0x10] sm:$0xff]   ;;  %vm250_vm0 = vcmask 654336   ;;  %vm368_vm1 = vcmask 125952  }
   0xc   : > { %483 = vmatprep.subr.bf16.mxu0 %v519_v0  ;;  %501 = vmatprep.subr.bf16.mxu1 %v519_v0  ;;  %s439_s21 = sshll.u32 %s625_s16, 2  ;;  %v522_v3 = vld [vmem:[%s621_s1 + $0x8] sm:$0xff]   ;;  %v523_v6 = vld [vmem:[%s621_s1] sm:$0xff]  }
   0xd   : > { %484 = vmatpush3.bf16.msra.mxu0 %v519_v0  ;;  %506 = vmatpush3.bf16.msra.mxu1 %v519_v0  ;;  %s166_s26 = scalar_lea.vmem %s620_s0, %s439_s21  ;;  %v442_v9 = vld [vmem:[%s622_s2] ss:$0 sm:$0xff]  ;;  %s599_s6 = scalar_lea.vmem %s623_s3, %s439_s21 }
   0xe   : > { %485 = vmatprep.subr.bf16.mxu0 %v520_v1  ;;  %502 = vmatprep.subr.bf16.mxu1 %v520_v1  ;;  %v524_v4 = vld [vmem:[%s166_s26] sm:$0xff]   ;;  %v525_v5 = vld [vmem:[%s166_s26 + $0x10] sm:$0xff]   ;;  %v526_v7 = vld [vmem:[%s166_s26 + $0x8] sm:$0xff]  }
   0xf   : > { %493 = vmatprep.mubr.msk.bf16.mxu0 %vm250_vm0, %v524_v4  ;;  %497 = vmatprep.mubr.msk.bf16.mxu1 %vm250_vm0, %v525_v5  ;;  %v527_v8 = vld [vmem:[%s166_s26 + $0x18] sm:$0xff]  }
  0x11   : > { %486 = vmatpush3.bf16.msra.mxu0 %v520_v1  ;;  %507 = vmatpush3.bf16.msra.mxu1 %v520_v1 }
  0x12   : > { %487 = vmatprep.subr.bf16.mxu0 %v521_v2  ;;  %503 = vmatprep.subr.bf16.mxu1 %v521_v2 }
  0x15   : > { %488 = vmatpush3.bf16.msra.mxu0 %v521_v2  ;;  %508 = vmatpush3.bf16.msra.mxu1 %v521_v2 }
  0x16   : > { %489 = vmatprep.subr.bf16.mxu0 %v522_v3  ;;  %504 = vmatprep.subr.bf16.mxu1 %v522_v3 }
  0x19   : > { %490 = vmatpush3.bf16.msra.mxu0 %v522_v3  ;;  %509 = vmatpush3.bf16.msra.mxu1 %v522_v3 }
  0x1a   : > { %491 = vmatprep.subr.bf16.mxu0 %v523_v6  ;;  %505 = vmatprep.subr.bf16.mxu1 %v523_v6 }
  0x1d   : > { %492 = vmatpush3.bf16.msra.mxu0 %v523_v6  ;;  %510 = vmatpush3.bf16.msra.mxu1 %v523_v6 }
  0x20   : > { %494 = vmatmul.mubr.msk.bf16.vlgmr.msra.gmra.mxu0 %vm250_vm0, %v526_v7  ;;  %498 = vmatmul.mubr.msk.bf16.vlgmr.msra.gmra.mxu1 %vm250_vm0, %v527_v8 }
  0xe0   : > { %v495_v10 = vpop.f32.mrf.mxu0  ;;  %v499_v11 = vpop.f32.mrf.mxu1 }
  0xe1   : > { %v306_v12 = vadd.f32 %v495_v10, %v442_v9  ;;  %v322_v13 = vadd.f32 %v499_v11, %v442_v9 }
  0xe2   : > { %v297_v14 = vpop.f32.mrf.mxu0  ;;  %v313_v15 = vpop.f32.mrf.mxu1 }
  0xe3   : > { %v330_v16 = vmax.f32 %v306_v12, 0.0  ;;  %v334_v17 = vmax.f32 %v322_v13, 0.0  ;;  %v298_v18 = vadd.f32 %v442_v9, %v297_v14  ;;  %v314_v19 = vadd.f32 %v442_v9, %v313_v15 }
  0xe4   : > { %v496_v20 = vpop.f32.mrf.mxu0  ;;  %v500_v21 = vpop.f32.mrf.mxu1 }
  0xe5   : > { %v468_v22 = vpack.c.bf16 %v330_v16, %v330_v16  ;;  %v472_v23 = vpack.c.bf16 %v334_v17, %v334_v17  ;;  %v328_v24 = vmax.f32 %v298_v18, 0.0  ;;  %v332_v25 = vmax.f32 %v314_v19, 0.0 }
  0xe6   : > { %v309_v26 = vadd.f32 %v496_v20, %v442_v9  ;;  %v325_v27 = vadd.f32 %v500_v21, %v442_v9  ;;  %v300_v28 = vpop.f32.mrf.mxu0  ;;  %v316_v29 = vpop.f32.mrf.mxu1 }
  0xe7   : > { %371 = vst.msk [vmem:[%s599_s6 + $0x8] sm:$0xf] %vm368_vm1, %v468_v22  ;;  %375 = vst.msk [vmem:[%s599_s6 + $0x18] sm:$0xf] %vm368_vm1, %v472_v23  ;;  %v466_v30 = vpack.c.bf16 %v328_v24, %v328_v24  ;;  %v470_v31 = vpack.c.bf16 %v332_v25, %v332_v25  ;;  %v301_v32 = vadd.f32 %v442_v9, %v300_v28 }
  0xe8   : > { %v317_v33 = vadd.f32 %v442_v9, %v316_v29  ;;  %v331_v34 = vmax.f32 %v309_v26, 0.0  ;;  %v335_v35 = vmax.f32 %v325_v27, 0.0 }
  0xe9   : > { %369 = vst.msk [vmem:[%s599_s6] sm:$0xf] %vm368_vm1, %v466_v30  ;;  %373 = vst.msk [vmem:[%s599_s6 + $0x10] sm:$0xf] %vm368_vm1, %v470_v31  ;;  %v329_v36 = vmax.f32 %v301_v32, 0.0 }
  0xea   : > { %v333_v37 = vmax.f32 %v317_v33, 0.0  ;;  %v469_v38 = vpack.c.bf16 %v331_v34, %v331_v34  ;;  %v473_v39 = vpack.c.bf16 %v335_v35, %v335_v35 }
  0xeb   : > { %v467_v40 = vpack.c.bf16 %v329_v36, %v329_v36 }
  0xec   : > { %v471_v41 = vpack.c.bf16 %v333_v37, %v333_v37  ;;  %372 = vst.msk [vmem:[%s599_s6 + $0xc] sm:$0xf] %vm368_vm1, %v469_v38  ;;  %376 = vst.msk [vmem:[%s599_s6 + $0x1c] sm:$0xf] %vm368_vm1, %v473_v39 }
  0xed   : > { %370 = vst.msk [vmem:[%s599_s6 + $0x4] sm:$0xf] %vm368_vm1, %v467_v40 }
  0xee   : > { %374 = vst.msk [vmem:[%s599_s6 + $0x14] sm:$0xf] %vm368_vm1, %v471_v41 }
  0xef PF: > { %s13_s12 = sadd.s32 1, %s534_s12  }
  0xf0   : > { %p10_p4 = scmp.ge.s32.totalorder %s13_s12, 4  }
  0xf2   :  { %12 = sbr.rel (!%p10_p4) target bundleno = 1 (0x1), region = 62 }

// kernel: _forward.8
= control target key start
LH: loop header
LB: loop body
LE: loop exit
PB: predicated region body
PF: predicated region fallthrough
CT: control target
= control target key end

     0   :  { %s462_s12 = smov 0   ;;  %s513_s0 = inlined_call_operand.vmem [shape: bf16[32,144], index: 0, kind: input, shape index: {}]   ;;  %s514_s1 = inlined_call_operand.vmem [shape: bf16[144,32], index: 1, kind: input, shape index: {}]   ;;  %s515_s2 = inlined_call_operand.vmem [shape: f32[1,32], index: 2, kind: input, shape index: {}]   ;;  %s516_s3 = inlined_call_operand.vmem [shape: bf16[32,32], index: 3, kind: output, shape index: {}]  }
   0x1 LB: > { %s382_s13 = sadd.s32 4294967295, %s439_s12   ;;  %p386_p0 = scmp.ge.s32.totalorder %s439_s12, 1  ;;  %s439_s12 = sphi %s462_s12, %s13_s12  }
   0x2   : > { %p139_p1 = scmp.lt.s32.totalorder %s439_s12, 3 }
   0x4   : > { %p140_p2 = pnand %p386_p0, %p139_p1 }
   0x5   : > { %s387_s16 = sshll.u32 (!%p140_p2), %s382_s13, 1 }
   0x6   : > { %143 = sbr.rel (%p140_p2) target bundleno = 252 (0xfc), region = 32  ;;  %p165_p3 = scmp.lt.s32.totalorder (!%p140_p2), %s387_s16, 3 }
   0xb   : > { %v421_v0 = vld [vmem:[%s514_s1 + $0x38] sm:$0xff]   ;;  %v441_v1 = vmov 0   ;;  %v422_v2 = vld [vmem:[%s514_s1 + $0x30] sm:$0xff]   ;;  %s518_s16 = smov (!%p165_p3, %s387_s16), 3  ;;  %v423_v3 = vld [vmem:[%s514_s1 + $0x28] sm:$0xff]   ;;  %vm268_vm0 = vcmask 130048  }
   0xc   : > { %272 = vmatprep.subr.bf16.mxu0 %v441_v1  ;;  %s409_s21 = sshll.u32 %s518_s16, 3  ;;  %v424_v4 = vld [vmem:[%s514_s1 + $0x20] sm:$0xff]   ;;  %v425_v6 = vld [vmem:[%s514_s1 + $0x18] sm:$0xff]   ;;  %v426_v7 = vld [vmem:[%s514_s1 + $0x10] sm:$0xff]   ;;  %s391_s13 = sshll.u32 %s518_s16, 2  ;;  %vm323_vm1 = vcmask 257024  }
   0xd   : > { %273 = vmatpush1.bf16.msra.mxu0 %v421_v0  ;;  %s169_s24 = scalar_lea.vmem %s513_s0, %s409_s21  ;;  %v427_v8 = vld [vmem:[%s514_s1 + $0x8] sm:$0xff]   ;;  %v428_v9 = vld [vmem:[%s514_s1] sm:$0xff]   ;;  %s175_s17 = scalar_lea.vmem %s516_s3, %s391_s13 }
   0xe   : > { %274 = vmatprep.subr.bf16.mxu0 %v441_v1  ;;  %v432_v5 = vld [vmem:[%s169_s24 + $0x4] ss:$8 sps:$4 sm:$0xff]   ;;  %v430_v11 = vld [vmem:[%s169_s24] ss:$8 sps:$4 sm:$0xff]  }
   0xf   : > { %404 = vmatprep.mubr.msk.bf16.mxu0 %vm268_vm0, %v432_v5  ;;  %v429_v10 = vld [vmem:[%s514_s1 + $0x40] sm:$0xff]  }
  0x10   : > { %v392_v12 = vld [vmem:[%s515_s2] ss:$0 sm:$0xff] }
  0x11   : > { %275 = vmatpush1.bf16.msra.mxu0 %v422_v2 }
  0x12   : > { %276 = vmatprep.subr.bf16.mxu0 %v441_v1 }
  0x15   : > { %277 = vmatpush1.bf16.msra.mxu0 %v423_v3 }
  0x16   : > { %278 = vmatprep.subr.bf16.mxu0 %v441_v1 }
  0x19   : > { %279 = vmatpush1.bf16.msra.mxu0 %v424_v4 }
  0x1a   : > { %280 = vmatprep.subr.bf16.mxu0 %v441_v1 }
  0x1d   : > { %281 = vmatpush1.bf16.msra.mxu0 %v425_v6 }
  0x1e   : > { %282 = vmatprep.subr.bf16.mxu0 %v441_v1 }
  0x21   : > { %283 = vmatpush1.bf16.msra.mxu0 %v426_v7 }
  0x22   : > { %284 = vmatprep.subr.bf16.mxu0 %v441_v1 }
  0x25   : > { %285 = vmatpush1.bf16.msra.mxu0 %v427_v8 }
  0x26   : > { %286 = vmatprep.subr.bf16.mxu0 %v441_v1 }
  0x29   : > { %287 = vmatpush1.bf16.msra.mxu0 %v428_v9 }
  0x2a   : > { %302 = vmatprep.subr.bf16.mxu0 %v441_v1 }
  0x2d   : > { %303 = vmatpush2.bf16.msra.mxu0 %v429_v10 }
  0x30   : > { %305 = vmatmul.mubr.bf16.vlgmr.msra.gmra.mxu0 %v430_v11 }
  0xf0   : > { %v306_v13 = vpop.f32.mrf.mxu0 }
  0xf1   : > { %v307_v14 = vadd.f32 %v392_v12, %v306_v13 }
  0xf2   : > { %v308_v15 = vpop.f32.mrf.mxu0 }
  0xf3   : > { %v313_v16 = vmax.f32 %v307_v14, 0.0 }
  0xf4   : > { %v309_v17 = vpop.f32.mrf.mxu0 }
  0xf5   : > { %v410_v18 = vpack.c.bf16 %v313_v16, %v313_v16  ;;  %v310_v19 = vadd.f32 %v392_v12, %v309_v17 }
  0xf6   : > { %v311_v20 = vpop.f32.mrf.mxu0 }
  0xf7   : > { %324 = vst.msk [vmem:[%s175_s17] sm:$0xf] %vm323_vm1, %v410_v18  ;;  %v314_v21 = vmax.f32 %v310_v19, 0.0 }
  0xf9   : > { %v411_v22 = vpack.c.bf16 %v314_v21, %v314_v21 }
  0xfb   : > { %325 = vst.msk [vmem:[%s175_s17 + $0x4] sm:$0xf] %vm323_vm1, %v411_v22 }
  0xfc PF: > { %s13_s12 = sadd.s32 1, %s439_s12  }
  0xfd   : > { %p10_p4 = scmp.ge.s32.totalorder %s13_s12, 4  }
  0xff   :  { %12 = sbr.rel (!%p10_p4) target bundleno = 1 (0x1), region = 62 }

// kernel: _forward.9
= control target key start
LH: loop header
LB: loop body
LE: loop exit
PB: predicated region body
PF: predicated region fallthrough
CT: control target
= control target key end

     0   :  { %v349_v1 = vmov 0.0   ;;  %vm350_vm0 = vmmov 0   ;;  %vm178_vm1 = vcmask 261120   ;;  %vm264_vm2 = vcmask 519168   ;;  %s437_s1 = inlined_call_operand.vmem [shape: bf16[288,64], index: 1, kind: input, shape index: {}]   ;;  %s438_s0 = inlined_call_operand.vmem [shape: bf16[8,288], index: 0, kind: input, shape index: {}]   ;;  %s439_s2 = inlined_call_operand.vmem [shape: f32[1,64], index: 2, kind: input, shape index: {}]   ;;  %s440_s3 = inlined_call_operand.vmem [shape: bf16[8,64], index: 3, kind: output, shape index: {}]  }
   0x1   :  { %v328_v0 = vld [vmem:[%s437_s1 + $0x78] sm:$0xff]   ;;  %318 = vmatprep.subr.bf16.mxu1 %v349_v1  ;;  %322 = vmatprep.mubr.msk.bf16.mxu1 %vm350_vm0, %v349_v1  ;;  %v330_v3 = vld [vmem:[%s437_s1 + $0x70] sm:$0xff]   ;;  %v332_v5 = vld [vmem:[%s437_s1 + $0x68] sm:$0xff]  }
   0x2   :  { %v329_v2 = vld [vmem:[%s437_s1 + $0x38] sm:$0xff]   ;;  %293 = vmatprep.subr.bf16.mxu0 %v328_v0  ;;  %v331_v4 = vld [vmem:[%s437_s1 + $0x30] sm:$0xff]   ;;  %v333_v6 = vld [vmem:[%s437_s1 + $0x28] sm:$0xff]  }
   0x3   :  { %294 = vmatpush3.bf16.msra.mxu0 %v329_v2  ;;  %v334_v7 = vld [vmem:[%s437_s1 + $0x60] sm:$0xff]   ;;  %v336_v9 = vld [vmem:[%s437_s1 + $0x58] sm:$0xff]   ;;  %v342_v10 = vld [vmem:[%s437_s1 + $0x88] sm:$0xff]  }
   0x4   :  { %295 = vmatprep.subr.bf16.mxu0 %v330_v3  ;;  %v335_v8 = vld [vmem:[%s437_s1 + $0x20] sm:$0xff]   ;;  %v337_v11 = vld [vmem:[%s437_s1 + $0x18] sm:$0xff]   ;;  %v338_v12 = vld [vmem:[%s437_s1 + $0x50] sm:$0xff]   ;;  %319 = vmatpush3.bf16.msra.mxu1 %v342_v10 }
   0x5   :  { %320 = vmatprep.subr.bf16.mxu1 %v349_v1  ;;  %v345_v13 = vld [vmem:[%s437_s1 + $0x80] sm:$0xff]   ;;  %v339_v15 = vld [vmem:[%s437_s1 + $0x10] sm:$0xff]   ;;  %v348_v17 = vld [vmem:[%s438_s0 + $0x8] ss:$0 sps:$4 sm:$0xff]  }
   0x6   :  { %v15_v14 = vld [vmem:[%s438_s0] sm:$0xff]  ;;  %v340_v18 = vld [vmem:[%s437_s1 + $0x48] sm:$0xff]  }
   0x7   :  { %296 = vmatpush3.bf16.msra.mxu0 %v331_v4  ;;  %v272_v16 = vcombine.high %v15_v14, %v15_v14  ;;  %v341_v19 = vld [vmem:[%s437_s1 + $0x8] sm:$0xff]   ;;  %v343_v20 = vld [vmem:[%s437_s1 + $0x40] sm:$0xff]   ;;  %v271_v22 = vcombine.low %v15_v14, %v15_v14 }
   0x8   :  { %297 = vmatprep.subr.bf16.mxu0 %v332_v5  ;;  %321 = vmatpush3.bf16.msra.mxu1 %v345_v13  ;;  %v344_v21 = vld [vmem:[%s437_s1] sm:$0xff]  }
   0x9   :  { %214 = vmatprep.mubr.bf16.mxu0 %v272_v16  ;;  %v270_v28 = vld [vmem:[%s439_s2] ss:$0 sm:$0xff] }
   0xb   :  { %298 = vmatpush3.bf16.msra.mxu0 %v333_v6  ;;  %323 = vmatmul.mubr.msk.bf16.vlgmr.msra.gmra.mxu1 %vm178_vm1, %v348_v17 }
   0xc   :  { %299 = vmatprep.subr.bf16.mxu0 %v334_v7 }
   0xf   :  { %300 = vmatpush3.bf16.msra.mxu0 %v335_v8 }
  0x10   :  { %301 = vmatprep.subr.bf16.mxu0 %v336_v9 }
  0x13   :  { %302 = vmatpush3.bf16.msra.mxu0 %v337_v11 }
  0x14   :  { %303 = vmatprep.subr.bf16.mxu0 %v338_v12 }
  0x17   :  { %304 = vmatpush3.bf16.msra.mxu0 %v339_v15 }
  0x18   :  { %305 = vmatprep.subr.bf16.mxu0 %v340_v18 }
  0x1b   :  { %306 = vmatpush3.bf16.msra.mxu0 %v341_v19 }
  0x1c   :  { %307 = vmatprep.subr.bf16.mxu0 %v343_v20 }
  0x1f   :  { %308 = vmatpush3.bf16.msra.mxu0 %v344_v21 }
  0x22   :  { %215 = vmatmul.mubr.bf16.vlgmr.msra.gmra.mxu0 %v271_v22 }
  0xcb   :  { %v256_v23 = vpop.f32.mrf.mxu1 }
  0xcd   :  { %v324_v24 = vpop.f32.mrf.mxu1 }
  0xcf   :  { %v259_v25 = vpop.f32.mrf.mxu1 }
  0xd1   :  { %v325_v26 = vpop.f32.mrf.mxu1 }
  0xe2   :  { %v309_v27 = vpop.f32.mrf.mxu0 }
  0xe4   :  { %v310_v29 = vpop.f32.mrf.mxu0 }
  0xe5   :  { %v311_v30 = vadd.f32 %v310_v29, %v309_v27 }
  0xe6   :  { %v312_v31 = vpop.f32.mrf.mxu0 }
  0xe7   :  { %v217_v32 = vadd.f32 %v311_v30, %v270_v28 }
  0xe8   :  { %v313_v33 = vpop.f32.mrf.mxu0 }
  0xe9   :  { %v257_v34 = vadd.f32 %v256_v23, %v217_v32 }
  0xeb   :  { %v262_v35 = vmax.f32 %v257_v34, 0.0 }
  0xed   :  { %v263_v36 = vpack.c.bf16 %v262_v35, %v262_v35 }
  0xef   :  { %265 = vst.msk [vmem:[%s440_s3] sm:$0xf] %vm264_vm2, %v263_v36 }

</bundles_post_ra>
